<compile_context>
chip_gen: v7x
topology: tpu7x:2x2x1
jax: 0.10.0
libtpu: 0.0.40
codegen_flags: <defaults>
</compile_context>

<pallas_src>
import functools

import jax
import jax.numpy as jnp
from jax.experimental import pallas as pl
from jax.experimental.pallas import tpu as pltpu


# ----------------------------------------------------------------------------
# Fused kernel: translate+ReLU -> LSTM (last hidden) -> SNLI head
# ----------------------------------------------------------------------------
def _sru_snli_kernel(emb_ref, wtr_ref, btr_ref, wih_ref, whh_ref, bl_ref,
                     win_ref, bin_ref, wfc_ref, bfc_ref, wout_ref, bout_ref,
                     o_ref, *, S, B, H, nfc):
    B2 = 2 * B          # both sentences packed along the batch dim
    H4 = 4 * H          # concatenated gate width (i, f, g, o)

    # 1) translate Linear(300 -> H) + ReLU, both sentences / all timesteps at
    #    once.  K axis is zero-padded to a multiple of 128 on the host, so the
    #    extra rows contribute exactly 0.
    x = jnp.maximum(
        jnp.dot(emb_ref[...], wtr_ref[...], preferred_element_type=jnp.float32)
        + btr_ref[...], 0.0)                                          # (S*2B, H) f32

    # 2) hoisted input projection for all gates & timesteps.
    #    bf16 operands -> single MXU pass; accumulate in f32.
    xg = (jnp.dot(x.astype(jnp.bfloat16), wih_ref[...],
                  preferred_element_type=jnp.float32)
          + bl_ref[...])                                              # (S*2B, 4H) f32

    # W_hh hoisted once outside the loop; bf16, rows [H, 4H) are zero.
    whh = whh_ref[...]                                                # (4H, 4H) bf16

    # 3) recurrence. h/c kept 4H wide: only lanes [0, H) are meaningful, the
    #    zero-padded rows of W_hh kill the junk lanes on every step, and all
    #    activations are bounded so the junk lanes can never blow up.
    h = jnp.zeros((B2, H4), jnp.float32)
    c = jnp.zeros((B2, H4), jnp.float32)
    for s in range(S):    # S is static -> fully unrolled straight-line code
        g = xg[s * B2:(s + 1) * B2, :] + jnp.dot(
            h.astype(jnp.bfloat16), whh,
            preferred_element_type=jnp.float32)                       # (2B, 4H) f32
        # Activate BEFORE rolling: one full-width sigmoid (tanh form -> single
        # EUP push) + one full-width tanh cover all 4 gate blocks, then XLU
        # rolls (free slot) bring each gate to lanes [0, H).
        sg = 0.5 * (jnp.tanh(0.5 * g) + 1.0)   # sigmoid(g) on all lanes
        tg = jnp.tanh(g)                        # tanh(g); lanes [2H,3H) are the g-gate
        i_a = sg                                                       # i at [0, H)
        f_a = pltpu.roll(sg, shift=3 * H, axis=1)                      # f -> [0, H)
        o_a = pltpu.roll(sg, shift=H, axis=1)                          # o -> [0, H)
        g_a = pltpu.roll(tg, shift=2 * H, axis=1)                      # g -> [0, H)
        c = f_a * c + i_a * g_a
        h = o_a * jnp.tanh(c)

    # 4) SNLI head. Build feats = [e0, e1, |e0-e1|, e0*e1] as one lane-dense
    #    (2B, 4H) tile (rolls place each H-wide piece), then a single K=4H
    #    matmul.  Rows [B, 2B) are junk but bounded; they are dropped at store.
    lane = jax.lax.broadcasted_iota(jnp.int32, (B2, H4), 1)
    e0 = jnp.where(lane < H, h, 0.0)                                  # rows [0,B): e0 in lanes [0,H)
    e1 = jnp.where(lane < H, pltpu.roll(h, shift=B, axis=0), 0.0)     # rows [0,B): e1 in lanes [0,H)
    feats = (e0
             + pltpu.roll(e1, shift=H, axis=1)
             + pltpu.roll(jnp.abs(e0 - e1), shift=2 * H, axis=1)
             + pltpu.roll(e0 * e1, shift=3 * H, axis=1))              # (2B, 4H)
    opt = (jnp.dot(feats, win_ref[...], preferred_element_type=jnp.float32)
           + bin_ref[...])                                            # (2B, H)
    # dropout (eval mode) == identity
    for k in range(nfc):
        opt = jnp.maximum(
            jnp.dot(opt, wfc_ref[k], preferred_element_type=jnp.float32)
            + bfc_ref[k], 0.0)                                        # ReLU activation
    out = (jnp.dot(opt, wout_ref[...], preferred_element_type=jnp.float32)
           + bout_ref[...])                                           # (2B, L)
    o_ref[...] = out[:B, :]                                           # keep the real batch rows


def sru_snli_fused_call(emb_flat, w_tr, b_tr, w_ih, w_hh_pad, b_lstm,
                        w_in, b_in, w_fcs, b_fcs, w_out, b_out, *, S, B, H):
    N, E = emb_flat.shape
    nfc = w_fcs.shape[0]
    L = w_out.shape[1]
    kernel = functools.partial(_sru_snli_kernel, S=S, B=B, H=H, nfc=nfc)

    def full(shape):
        n = len(shape)
        return pl.BlockSpec(shape, lambda i: (0,) * n)

    return pl.pallas_call(
        kernel,
        out_shape=jax.ShapeDtypeStruct((B, L), jnp.float32),
        grid=(1,),
        in_specs=[
            full((N, E)), full((E, H)), full((1, H)),
            full((H, 4 * H)), full((4 * H, 4 * H)), full((1, 4 * H)),
            full((4 * H, H)), full((1, H)),
            full((nfc, H, H)), full((nfc, 1, H)),
            full((H, L)), full((1, L)),
        ],
        out_specs=full((B, L)),
    )(emb_flat, w_tr, b_tr, w_ih, w_hh_pad, b_lstm,
      w_in, b_in, w_fcs, b_fcs, w_out, b_out)


# ----------------------------------------------------------------------------
# Model glue: parameters + forward
# ----------------------------------------------------------------------------
def init_params(key, vocab_size, emb_dim, hidden, nfc, opt_labels, padding_idx=0):
    ks = jax.random.split(key, 12)

    def u(k, shape, fan_in):
        bound = 1.0 / jnp.sqrt(fan_in)
        return jax.random.uniform(k, shape, jnp.float32, -bound, bound)

    emb = jax.random.normal(ks[0], (vocab_size, emb_dim), jnp.float32)
    emb = emb.at[padding_idx].set(0.0)

    H = hidden
    p = {
        "emb": emb,
        # translate: Linear(300 -> H), stored (in, out)
        "w_tr": u(ks[1], (emb_dim, H), emb_dim),
        "b_tr": u(ks[2], (1, H), emb_dim),
        # LSTM, gate order (i, f, g, o) concatenated along the output dim, stored (in, out)
        "w_ih": u(ks[3], (H, 4 * H), H),
        "w_hh": u(ks[4], (H, 4 * H), H),
        "b_lstm": u(ks[5], (1, 4 * H), H) + u(ks[6], (1, 4 * H), H),   # b_ih + b_hh
        # fc_in: Linear(4H -> H); rows ordered to match concat [e0, e1, |e0-e1|, e0*e1]
        "w_in": u(ks[7], (4 * H, H), 4 * H),
        "b_in": u(ks[8], (1, H), 4 * H),
        # fcs: nfc x Linear(H -> H)
        "w_fcs": u(ks[9], (nfc, H, H), H),
        "b_fcs": u(ks[10], (nfc, 1, H), H),
        # fc_out: Linear(H -> opt_labels)
        "w_out": u(ks[11], (H, opt_labels), H),
        "b_out": jnp.zeros((1, opt_labels), jnp.float32),
    }
    return p


def sru_snli_forward(x0, x1, p):
    # x0, x1: (B, S) int32 token ids
    B, S = x0.shape
    E = p["w_tr"].shape[0]
    H = p["w_tr"].shape[1]
    # Roll-based gate extraction / head assembly assumes one vreg lane width.
    assert 4 * H == 128, "kernel layout requires 4*hidden_size == 128"

    # gather time-major so the kernel needs no activation transpose:
    # row order of emb_flat is (s, pair, b)  ->  per-timestep blocks of 2B rows.
    tok = jnp.stack([x0, x1], axis=0)                         # (2, B, S)
    tok = jnp.transpose(tok, (2, 0, 1)).reshape(S, 2 * B)     # (S, 2B)  (tiny int transpose)
    emb = jnp.take(p["emb"], tok, axis=0)                     # (S, 2B, E)
    emb_flat = emb.reshape(S * 2 * B, E)

    # pad the translate K axis to a multiple of 128 (300 -> 384), zero-filled
    E_pad = ((E + 127) // 128) * 128
    emb_pad = jnp.zeros((S * 2 * B, E_pad), jnp.float32).at[:, :E].set(emb_flat)
    w_tr_pad = jnp.zeros((E_pad, H), jnp.float32).at[:E, :].set(p["w_tr"])

    # zero-pad W_hh rows to 4H so the recurrence stays 4H wide without slicing h;
    # cast the recurrence-path weights to bf16 (single MXU pass, half the vld).
    w_hh_pad = jnp.zeros((4 * H, 4 * H), jnp.float32).at[:H, :].set(p["w_hh"])
    w_hh_bf = w_hh_pad.astype(jnp.bfloat16)
    w_ih_bf = p["w_ih"].astype(jnp.bfloat16)

    out = sru_snli_fused_call(
        emb_pad, w_tr_pad, p["b_tr"], w_ih_bf, w_hh_bf, p["b_lstm"],
        p["w_in"], p["b_in"], p["w_fcs"], p["b_fcs"], p["w_out"], p["b_out"],
        S=S, B=B, H=H)
    return out[None]                                          # (1, B, opt_labels)


# ----------------------------------------------------------------------------
# Pure-JAX reference (for correctness check)
# ----------------------------------------------------------------------------
def reference_forward(x0, x1, p):
    H = p["w_tr"].shape[1]

    def enc(tok):
        emb = jnp.take(p["emb"], tok, axis=0)                         # (B, S, E)
        h = jnp.maximum(emb @ p["w_tr"] + p["b_tr"][0], 0.0)          # (B, S, H)
        x = jnp.transpose(h, (1, 0, 2))                               # (S, B, H)
        Bb = x.shape[1]

        def step(carry, xt):
            hp, cp = carry
            gates = xt @ p["w_ih"] + hp @ p["w_hh"] + p["b_lstm"][0]  # (B, 4H)
            i = jax.nn.sigmoid(gates[:, 0 * H:1 * H])
            f = jax.nn.sigmoid(gates[:, 1 * H:2 * H])
            g = jnp.tanh(gates[:, 2 * H:3 * H])
            o = jax.nn.sigmoid(gates[:, 3 * H:4 * H])
            c = f * cp + i * g
            return (o * jnp.tanh(c), c), None

        (hT, _), _ = jax.lax.scan(
            step, (jnp.zeros((Bb, H), jnp.float32),
                   jnp.zeros((Bb, H), jnp.float32)), x)
        return hT

    e0 = enc(x0)
    e1 = enc(x1)
    feats = jnp.concatenate([e0, e1, jnp.abs(e0 - e1), e0 * e1], axis=-1)
    opt = feats @ p["w_in"] + p["b_in"][0]
    for k in range(p["w_fcs"].shape[0]):
        opt = jnp.maximum(opt @ p["w_fcs"][k] + p["b_fcs"][k][0], 0.0)
    out = opt @ p["w_out"] + p["b_out"][0]
    return out[None]


# ----------------------------------------------------------------------------
if __name__ == "__main__":
    # conf: vocab_size=50, embedding_dim=300, hidden_size=32, num_layers=1,
    #       bidirectional=False, activation='relu', fcs=2, opt_labels=3,
    #       dropout (eval) = identity, padding_idx=0
    VOCAB, EMB, HID, NFC, LABELS = 50, 300, 32, 2, 3
    B, S = 4, 8          # B=4 so the packed 2B=8 rows are sublane-tile aligned

    key = jax.random.PRNGKey(0)
    kp, k0, k1 = jax.random.split(key, 3)
    params = init_params(kp, VOCAB, EMB, HID, NFC, LABELS)

    x0 = jax.random.randint(k0, (B, S), 0, VOCAB, dtype=jnp.int32)
    x1 = jax.random.randint(k1, (B, S), 0, VOCAB, dtype=jnp.int32)

    out = jax.block_until_ready(sru_snli_forward(x0, x1, params))
    ref = jax.block_until_ready(reference_forward(x0, x1, params))

    assert out.shape == (1, B, LABELS), out.shape
    assert jnp.allclose(out, ref, rtol=1e-2, atol=1e-2), (out, ref)
    print("KERNEL_OK")
</pallas_src>

<mosaic_0001>
module attributes {stable_mosaic.version = 11 : i64} {
  func.func @_sru_snli_kernel(%arg0: i32, %arg1: memref<64x384xf32, #tpu.memory_space<vmem>>, %arg2: memref<384x32xf32, #tpu.memory_space<vmem>>, %arg3: memref<1x32xf32, #tpu.memory_space<vmem>>, %arg4: memref<32x128xbf16, #tpu.memory_space<vmem>>, %arg5: memref<128x128xbf16, #tpu.memory_space<vmem>>, %arg6: memref<1x128xf32, #tpu.memory_space<vmem>>, %arg7: memref<128x32xf32, #tpu.memory_space<vmem>>, %arg8: memref<1x32xf32, #tpu.memory_space<vmem>>, %arg9: memref<2x32x32xf32, #tpu.memory_space<vmem>>, %arg10: memref<2x1x32xf32, #tpu.memory_space<vmem>>, %arg11: memref<32x3xf32, #tpu.memory_space<vmem>>, %arg12: memref<1x3xf32, #tpu.memory_space<vmem>>, %arg13: memref<4x3xf32, #tpu.memory_space<vmem>>) attributes {dimension_semantics = [#tpu.dimension_semantics<arbitrary>], iteration_bounds = array<i64: 1>, scalar_prefetch = 0 : i64, scratch_operands = 0 : i64, tpu.core_type = #tpu.core_type<tc>, window_params = [{pipeline_mode = #tpu.pipeline_mode<synchronous>, transform_indices = @transform_0, window_bounds = array<i64: 64, 384>}, {pipeline_mode = #tpu.pipeline_mode<synchronous>, transform_indices = @transform_1, window_bounds = array<i64: 384, 32>}, {pipeline_mode = #tpu.pipeline_mode<synchronous>, transform_indices = @transform_2, window_bounds = array<i64: 1, 32>}, {pipeline_mode = #tpu.pipeline_mode<synchronous>, transform_indices = @transform_3, window_bounds = array<i64: 32, 128>}, {pipeline_mode = #tpu.pipeline_mode<synchronous>, transform_indices = @transform_4, window_bounds = array<i64: 128, 128>}, {pipeline_mode = #tpu.pipeline_mode<synchronous>, transform_indices = @transform_5, window_bounds = array<i64: 1, 128>}, {pipeline_mode = #tpu.pipeline_mode<synchronous>, transform_indices = @transform_6, window_bounds = array<i64: 128, 32>}, {pipeline_mode = #tpu.pipeline_mode<synchronous>, transform_indices = @transform_7, window_bounds = array<i64: 1, 32>}, {pipeline_mode = #tpu.pipeline_mode<synchronous>, transform_indices = @transform_8, window_bounds = array<i64: 2, 32, 32>}, {pipeline_mode = #tpu.pipeline_mode<synchronous>, transform_indices = @transform_9, window_bounds = array<i64: 2, 1, 32>}, {pipeline_mode = #tpu.pipeline_mode<synchronous>, transform_indices = @transform_10, window_bounds = array<i64: 32, 3>}, {pipeline_mode = #tpu.pipeline_mode<synchronous>, transform_indices = @transform_11, window_bounds = array<i64: 1, 3>}, {pipeline_mode = #tpu.pipeline_mode<synchronous>, transform_indices = @transform_12, window_bounds = array<i64: 4, 3>}]} {
    %c0 = arith.constant 0 : index
    %c0_0 = arith.constant 0 : index
    %0 = vector.load %arg1[%c0, %c0_0] : memref<64x384xf32, #tpu.memory_space<vmem>>, vector<64x384xf32>
    %c0_1 = arith.constant 0 : index
    %c0_2 = arith.constant 0 : index
    %1 = vector.load %arg2[%c0_1, %c0_2] : memref<384x32xf32, #tpu.memory_space<vmem>>, vector<384x32xf32>
    %cst = arith.constant dense<0.000000e+00> : vector<64x32xf32>
    %2 = tpu.matmul %0, %1, %cst {dimension_numbers = #tpu.dot_dimension_numbers<[1], [0], [0], [1], [0, 0, 1, 1], [], []>} : vector<64x384xf32>, vector<384x32xf32>, vector<64x32xf32> -> vector<64x32xf32>
    %c0_3 = arith.constant 0 : index
    %c0_4 = arith.constant 0 : index
    %3 = vector.load %arg3[%c0_3, %c0_4] : memref<1x32xf32, #tpu.memory_space<vmem>>, vector<1x32xf32>
    %4 = vector.broadcast %3 : vector<1x32xf32> to vector<64x32xf32>
    %5 = arith.addf %2, %4 : vector<64x32xf32>
    %cst_5 = arith.constant 0.000000e+00 : f32
    %6 = vector.broadcast %cst_5 : f32 to vector<64x32xf32>
    %7 = arith.maximumf %5, %6 : vector<64x32xf32>
    %8 = arith.truncf %7 : vector<64x32xf32> to vector<64x32xbf16>
    %c0_6 = arith.constant 0 : index
    %c0_7 = arith.constant 0 : index
    %9 = vector.load %arg4[%c0_6, %c0_7] : memref<32x128xbf16, #tpu.memory_space<vmem>>, vector<32x128xbf16>
    %cst_8 = arith.constant dense<0.000000e+00> : vector<64x128xf32>
    %10 = tpu.matmul %8, %9, %cst_8 {dimension_numbers = #tpu.dot_dimension_numbers<[1], [0], [0], [1], [0, 0, 1, 1], [], []>} : vector<64x32xbf16>, vector<32x128xbf16>, vector<64x128xf32> -> vector<64x128xf32>
    %c0_9 = arith.constant 0 : index
    %c0_10 = arith.constant 0 : index
    %11 = vector.load %arg6[%c0_9, %c0_10] : memref<1x128xf32, #tpu.memory_space<vmem>>, vector<1x128xf32>
    %12 = vector.broadcast %11 : vector<1x128xf32> to vector<64x128xf32>
    %13 = arith.addf %10, %12 : vector<64x128xf32>
    %c0_11 = arith.constant 0 : index
    %c0_12 = arith.constant 0 : index
    %14 = vector.load %arg5[%c0_11, %c0_12] : memref<128x128xbf16, #tpu.memory_space<vmem>>, vector<128x128xbf16>
    %cst_13 = arith.constant 0.000000e+00 : f32
    %15 = vector.broadcast %cst_13 : f32 to vector<8x128xf32>
    %cst_14 = arith.constant 0.000000e+00 : f32
    %16 = vector.broadcast %cst_14 : f32 to vector<8x128xf32>
    %17 = vector.extract_strided_slice %13 {offsets = [0, 0], sizes = [8, 128], strides = [1, 1]} : vector<64x128xf32> to vector<8x128xf32>
    %18 = arith.truncf %15 : vector<8x128xf32> to vector<8x128xbf16>
    %cst_15 = arith.constant dense<0.000000e+00> : vector<8x128xf32>
    %19 = tpu.matmul %18, %14, %cst_15 {dimension_numbers = #tpu.dot_dimension_numbers<[1], [0], [0], [1], [0, 0, 1, 1], [], []>} : vector<8x128xbf16>, vector<128x128xbf16>, vector<8x128xf32> -> vector<8x128xf32>
    %20 = arith.addf %17, %19 : vector<8x128xf32>
    %cst_16 = arith.constant 5.000000e-01 : f32
    %21 = vector.broadcast %cst_16 : f32 to vector<8x128xf32>
    %22 = arith.mulf %21, %20 : vector<8x128xf32>
    %23 = math.tanh %22 : vector<8x128xf32>
    %cst_17 = arith.constant 1.000000e+00 : f32
    %24 = vector.broadcast %cst_17 : f32 to vector<8x128xf32>
    %25 = arith.addf %23, %24 : vector<8x128xf32>
    %cst_18 = arith.constant 5.000000e-01 : f32
    %26 = vector.broadcast %cst_18 : f32 to vector<8x128xf32>
    %27 = arith.mulf %26, %25 : vector<8x128xf32>
    %28 = math.tanh %20 : vector<8x128xf32>
    %c96_i32 = arith.constant 96 : i32
    %29 = tpu.dynamic_rotate %27 by %c96_i32 dim 1 : vector<8x128xf32>, i32 -> vector<8x128xf32>
    %c32_i32 = arith.constant 32 : i32
    %30 = tpu.dynamic_rotate %27 by %c32_i32 dim 1 : vector<8x128xf32>, i32 -> vector<8x128xf32>
    %c64_i32 = arith.constant 64 : i32
    %31 = tpu.dynamic_rotate %28 by %c64_i32 dim 1 : vector<8x128xf32>, i32 -> vector<8x128xf32>
    %32 = arith.mulf %29, %16 : vector<8x128xf32>
    %33 = arith.mulf %27, %31 : vector<8x128xf32>
    %34 = arith.addf %32, %33 : vector<8x128xf32>
    %35 = math.tanh %34 : vector<8x128xf32>
    %36 = arith.mulf %30, %35 : vector<8x128xf32>
    %37 = vector.extract_strided_slice %13 {offsets = [8, 0], sizes = [8, 128], strides = [1, 1]} : vector<64x128xf32> to vector<8x128xf32>
    %38 = arith.truncf %36 : vector<8x128xf32> to vector<8x128xbf16>
    %cst_19 = arith.constant dense<0.000000e+00> : vector<8x128xf32>
    %39 = tpu.matmul %38, %14, %cst_19 {dimension_numbers = #tpu.dot_dimension_numbers<[1], [0], [0], [1], [0, 0, 1, 1], [], []>} : vector<8x128xbf16>, vector<128x128xbf16>, vector<8x128xf32> -> vector<8x128xf32>
    %40 = arith.addf %37, %39 : vector<8x128xf32>
    %cst_20 = arith.constant 5.000000e-01 : f32
    %41 = vector.broadcast %cst_20 : f32 to vector<8x128xf32>
    %42 = arith.mulf %41, %40 : vector<8x128xf32>
    %43 = math.tanh %42 : vector<8x128xf32>
    %cst_21 = arith.constant 1.000000e+00 : f32
    %44 = vector.broadcast %cst_21 : f32 to vector<8x128xf32>
    %45 = arith.addf %43, %44 : vector<8x128xf32>
    %cst_22 = arith.constant 5.000000e-01 : f32
    %46 = vector.broadcast %cst_22 : f32 to vector<8x128xf32>
    %47 = arith.mulf %46, %45 : vector<8x128xf32>
    %48 = math.tanh %40 : vector<8x128xf32>
    %c96_i32_23 = arith.constant 96 : i32
    %49 = tpu.dynamic_rotate %47 by %c96_i32_23 dim 1 : vector<8x128xf32>, i32 -> vector<8x128xf32>
    %c32_i32_24 = arith.constant 32 : i32
    %50 = tpu.dynamic_rotate %47 by %c32_i32_24 dim 1 : vector<8x128xf32>, i32 -> vector<8x128xf32>
    %c64_i32_25 = arith.constant 64 : i32
    %51 = tpu.dynamic_rotate %48 by %c64_i32_25 dim 1 : vector<8x128xf32>, i32 -> vector<8x128xf32>
    %52 = arith.mulf %49, %34 : vector<8x128xf32>
    %53 = arith.mulf %47, %51 : vector<8x128xf32>
    %54 = arith.addf %52, %53 : vector<8x128xf32>
    %55 = math.tanh %54 : vector<8x128xf32>
    %56 = arith.mulf %50, %55 : vector<8x128xf32>
    %57 = vector.extract_strided_slice %13 {offsets = [16, 0], sizes = [8, 128], strides = [1, 1]} : vector<64x128xf32> to vector<8x128xf32>
    %58 = arith.truncf %56 : vector<8x128xf32> to vector<8x128xbf16>
    %cst_26 = arith.constant dense<0.000000e+00> : vector<8x128xf32>
    %59 = tpu.matmul %58, %14, %cst_26 {dimension_numbers = #tpu.dot_dimension_numbers<[1], [0], [0], [1], [0, 0, 1, 1], [], []>} : vector<8x128xbf16>, vector<128x128xbf16>, vector<8x128xf32> -> vector<8x128xf32>
    %60 = arith.addf %57, %59 : vector<8x128xf32>
    %cst_27 = arith.constant 5.000000e-01 : f32
    %61 = vector.broadcast %cst_27 : f32 to vector<8x128xf32>
    %62 = arith.mulf %61, %60 : vector<8x128xf32>
    %63 = math.tanh %62 : vector<8x128xf32>
    %cst_28 = arith.constant 1.000000e+00 : f32
    %64 = vector.broadcast %cst_28 : f32 to vector<8x128xf32>
    %65 = arith.addf %63, %64 : vector<8x128xf32>
    %cst_29 = arith.constant 5.000000e-01 : f32
    %66 = vector.broadcast %cst_29 : f32 to vector<8x128xf32>
    %67 = arith.mulf %66, %65 : vector<8x128xf32>
    %68 = math.tanh %60 : vector<8x128xf32>
    %c96_i32_30 = arith.constant 96 : i32
    %69 = tpu.dynamic_rotate %67 by %c96_i32_30 dim 1 : vector<8x128xf32>, i32 -> vector<8x128xf32>
    %c32_i32_31 = arith.constant 32 : i32
    %70 = tpu.dynamic_rotate %67 by %c32_i32_31 dim 1 : vector<8x128xf32>, i32 -> vector<8x128xf32>
    %c64_i32_32 = arith.constant 64 : i32
    %71 = tpu.dynamic_rotate %68 by %c64_i32_32 dim 1 : vector<8x128xf32>, i32 -> vector<8x128xf32>
    %72 = arith.mulf %69, %54 : vector<8x128xf32>
    %73 = arith.mulf %67, %71 : vector<8x128xf32>
    %74 = arith.addf %72, %73 : vector<8x128xf32>
    %75 = math.tanh %74 : vector<8x128xf32>
    %76 = arith.mulf %70, %75 : vector<8x128xf32>
    %77 = vector.extract_strided_slice %13 {offsets = [24, 0], sizes = [8, 128], strides = [1, 1]} : vector<64x128xf32> to vector<8x128xf32>
    %78 = arith.truncf %76 : vector<8x128xf32> to vector<8x128xbf16>
    %cst_33 = arith.constant dense<0.000000e+00> : vector<8x128xf32>
    %79 = tpu.matmul %78, %14, %cst_33 {dimension_numbers = #tpu.dot_dimension_numbers<[1], [0], [0], [1], [0, 0, 1, 1], [], []>} : vector<8x128xbf16>, vector<128x128xbf16>, vector<8x128xf32> -> vector<8x128xf32>
    %80 = arith.addf %77, %79 : vector<8x128xf32>
    %cst_34 = arith.constant 5.000000e-01 : f32
    %81 = vector.broadcast %cst_34 : f32 to vector<8x128xf32>
    %82 = arith.mulf %81, %80 : vector<8x128xf32>
    %83 = math.tanh %82 : vector<8x128xf32>
    %cst_35 = arith.constant 1.000000e+00 : f32
    %84 = vector.broadcast %cst_35 : f32 to vector<8x128xf32>
    %85 = arith.addf %83, %84 : vector<8x128xf32>
    %cst_36 = arith.constant 5.000000e-01 : f32
    %86 = vector.broadcast %cst_36 : f32 to vector<8x128xf32>
    %87 = arith.mulf %86, %85 : vector<8x128xf32>
    %88 = math.tanh %80 : vector<8x128xf32>
    %c96_i32_37 = arith.constant 96 : i32
    %89 = tpu.dynamic_rotate %87 by %c96_i32_37 dim 1 : vector<8x128xf32>, i32 -> vector<8x128xf32>
    %c32_i32_38 = arith.constant 32 : i32
    %90 = tpu.dynamic_rotate %87 by %c32_i32_38 dim 1 : vector<8x128xf32>, i32 -> vector<8x128xf32>
    %c64_i32_39 = arith.constant 64 : i32
    %91 = tpu.dynamic_rotate %88 by %c64_i32_39 dim 1 : vector<8x128xf32>, i32 -> vector<8x128xf32>
    %92 = arith.mulf %89, %74 : vector<8x128xf32>
    %93 = arith.mulf %87, %91 : vector<8x128xf32>
    %94 = arith.addf %92, %93 : vector<8x128xf32>
    %95 = math.tanh %94 : vector<8x128xf32>
    %96 = arith.mulf %90, %95 : vector<8x128xf32>
    %97 = vector.extract_strided_slice %13 {offsets = [32, 0], sizes = [8, 128], strides = [1, 1]} : vector<64x128xf32> to vector<8x128xf32>
    %98 = arith.truncf %96 : vector<8x128xf32> to vector<8x128xbf16>
    %cst_40 = arith.constant dense<0.000000e+00> : vector<8x128xf32>
    %99 = tpu.matmul %98, %14, %cst_40 {dimension_numbers = #tpu.dot_dimension_numbers<[1], [0], [0], [1], [0, 0, 1, 1], [], []>} : vector<8x128xbf16>, vector<128x128xbf16>, vector<8x128xf32> -> vector<8x128xf32>
    %100 = arith.addf %97, %99 : vector<8x128xf32>
    %cst_41 = arith.constant 5.000000e-01 : f32
    %101 = vector.broadcast %cst_41 : f32 to vector<8x128xf32>
    %102 = arith.mulf %101, %100 : vector<8x128xf32>
    %103 = math.tanh %102 : vector<8x128xf32>
    %cst_42 = arith.constant 1.000000e+00 : f32
    %104 = vector.broadcast %cst_42 : f32 to vector<8x128xf32>
    %105 = arith.addf %103, %104 : vector<8x128xf32>
    %cst_43 = arith.constant 5.000000e-01 : f32
    %106 = vector.broadcast %cst_43 : f32 to vector<8x128xf32>
    %107 = arith.mulf %106, %105 : vector<8x128xf32>
    %108 = math.tanh %100 : vector<8x128xf32>
    %c96_i32_44 = arith.constant 96 : i32
    %109 = tpu.dynamic_rotate %107 by %c96_i32_44 dim 1 : vector<8x128xf32>, i32 -> vector<8x128xf32>
    %c32_i32_45 = arith.constant 32 : i32
    %110 = tpu.dynamic_rotate %107 by %c32_i32_45 dim 1 : vector<8x128xf32>, i32 -> vector<8x128xf32>
    %c64_i32_46 = arith.constant 64 : i32
    %111 = tpu.dynamic_rotate %108 by %c64_i32_46 dim 1 : vector<8x128xf32>, i32 -> vector<8x128xf32>
    %112 = arith.mulf %109, %94 : vector<8x128xf32>
    %113 = arith.mulf %107, %111 : vector<8x128xf32>
    %114 = arith.addf %112, %113 : vector<8x128xf32>
    %115 = math.tanh %114 : vector<8x128xf32>
    %116 = arith.mulf %110, %115 : vector<8x128xf32>
    %117 = vector.extract_strided_slice %13 {offsets = [40, 0], sizes = [8, 128], strides = [1, 1]} : vector<64x128xf32> to vector<8x128xf32>
    %118 = arith.truncf %116 : vector<8x128xf32> to vector<8x128xbf16>
    %cst_47 = arith.constant dense<0.000000e+00> : vector<8x128xf32>
    %119 = tpu.matmul %118, %14, %cst_47 {dimension_numbers = #tpu.dot_dimension_numbers<[1], [0], [0], [1], [0, 0, 1, 1], [], []>} : vector<8x128xbf16>, vector<128x128xbf16>, vector<8x128xf32> -> vector<8x128xf32>
    %120 = arith.addf %117, %119 : vector<8x128xf32>
    %cst_48 = arith.constant 5.000000e-01 : f32
    %121 = vector.broadcast %cst_48 : f32 to vector<8x128xf32>
    %122 = arith.mulf %121, %120 : vector<8x128xf32>
    %123 = math.tanh %122 : vector<8x128xf32>
    %cst_49 = arith.constant 1.000000e+00 : f32
    %124 = vector.broadcast %cst_49 : f32 to vector<8x128xf32>
    %125 = arith.addf %123, %124 : vector<8x128xf32>
    %cst_50 = arith.constant 5.000000e-01 : f32
    %126 = vector.broadcast %cst_50 : f32 to vector<8x128xf32>
    %127 = arith.mulf %126, %125 : vector<8x128xf32>
    %128 = math.tanh %120 : vector<8x128xf32>
    %c96_i32_51 = arith.constant 96 : i32
    %129 = tpu.dynamic_rotate %127 by %c96_i32_51 dim 1 : vector<8x128xf32>, i32 -> vector<8x128xf32>
    %c32_i32_52 = arith.constant 32 : i32
    %130 = tpu.dynamic_rotate %127 by %c32_i32_52 dim 1 : vector<8x128xf32>, i32 -> vector<8x128xf32>
    %c64_i32_53 = arith.constant 64 : i32
    %131 = tpu.dynamic_rotate %128 by %c64_i32_53 dim 1 : vector<8x128xf32>, i32 -> vector<8x128xf32>
    %132 = arith.mulf %129, %114 : vector<8x128xf32>
    %133 = arith.mulf %127, %131 : vector<8x128xf32>
    %134 = arith.addf %132, %133 : vector<8x128xf32>
    %135 = math.tanh %134 : vector<8x128xf32>
    %136 = arith.mulf %130, %135 : vector<8x128xf32>
    %137 = vector.extract_strided_slice %13 {offsets = [48, 0], sizes = [8, 128], strides = [1, 1]} : vector<64x128xf32> to vector<8x128xf32>
    %138 = arith.truncf %136 : vector<8x128xf32> to vector<8x128xbf16>
    %cst_54 = arith.constant dense<0.000000e+00> : vector<8x128xf32>
    %139 = tpu.matmul %138, %14, %cst_54 {dimension_numbers = #tpu.dot_dimension_numbers<[1], [0], [0], [1], [0, 0, 1, 1], [], []>} : vector<8x128xbf16>, vector<128x128xbf16>, vector<8x128xf32> -> vector<8x128xf32>
    %140 = arith.addf %137, %139 : vector<8x128xf32>
    %cst_55 = arith.constant 5.000000e-01 : f32
    %141 = vector.broadcast %cst_55 : f32 to vector<8x128xf32>
    %142 = arith.mulf %141, %140 : vector<8x128xf32>
    %143 = math.tanh %142 : vector<8x128xf32>
    %cst_56 = arith.constant 1.000000e+00 : f32
    %144 = vector.broadcast %cst_56 : f32 to vector<8x128xf32>
    %145 = arith.addf %143, %144 : vector<8x128xf32>
    %cst_57 = arith.constant 5.000000e-01 : f32
    %146 = vector.broadcast %cst_57 : f32 to vector<8x128xf32>
    %147 = arith.mulf %146, %145 : vector<8x128xf32>
    %148 = math.tanh %140 : vector<8x128xf32>
    %c96_i32_58 = arith.constant 96 : i32
    %149 = tpu.dynamic_rotate %147 by %c96_i32_58 dim 1 : vector<8x128xf32>, i32 -> vector<8x128xf32>
    %c32_i32_59 = arith.constant 32 : i32
    %150 = tpu.dynamic_rotate %147 by %c32_i32_59 dim 1 : vector<8x128xf32>, i32 -> vector<8x128xf32>
    %c64_i32_60 = arith.constant 64 : i32
    %151 = tpu.dynamic_rotate %148 by %c64_i32_60 dim 1 : vector<8x128xf32>, i32 -> vector<8x128xf32>
    %152 = arith.mulf %149, %134 : vector<8x128xf32>
    %153 = arith.mulf %147, %151 : vector<8x128xf32>
    %154 = arith.addf %152, %153 : vector<8x128xf32>
    %155 = math.tanh %154 : vector<8x128xf32>
    %156 = arith.mulf %150, %155 : vector<8x128xf32>
    %157 = vector.extract_strided_slice %13 {offsets = [56, 0], sizes = [8, 128], strides = [1, 1]} : vector<64x128xf32> to vector<8x128xf32>
    %158 = arith.truncf %156 : vector<8x128xf32> to vector<8x128xbf16>
    %cst_61 = arith.constant dense<0.000000e+00> : vector<8x128xf32>
    %159 = tpu.matmul %158, %14, %cst_61 {dimension_numbers = #tpu.dot_dimension_numbers<[1], [0], [0], [1], [0, 0, 1, 1], [], []>} : vector<8x128xbf16>, vector<128x128xbf16>, vector<8x128xf32> -> vector<8x128xf32>
    %160 = arith.addf %157, %159 : vector<8x128xf32>
    %cst_62 = arith.constant 5.000000e-01 : f32
    %161 = vector.broadcast %cst_62 : f32 to vector<8x128xf32>
    %162 = arith.mulf %161, %160 : vector<8x128xf32>
    %163 = math.tanh %162 : vector<8x128xf32>
    %cst_63 = arith.constant 1.000000e+00 : f32
    %164 = vector.broadcast %cst_63 : f32 to vector<8x128xf32>
    %165 = arith.addf %163, %164 : vector<8x128xf32>
    %cst_64 = arith.constant 5.000000e-01 : f32
    %166 = vector.broadcast %cst_64 : f32 to vector<8x128xf32>
    %167 = arith.mulf %166, %165 : vector<8x128xf32>
    %168 = math.tanh %160 : vector<8x128xf32>
    %c96_i32_65 = arith.constant 96 : i32
    %169 = tpu.dynamic_rotate %167 by %c96_i32_65 dim 1 : vector<8x128xf32>, i32 -> vector<8x128xf32>
    %c32_i32_66 = arith.constant 32 : i32
    %170 = tpu.dynamic_rotate %167 by %c32_i32_66 dim 1 : vector<8x128xf32>, i32 -> vector<8x128xf32>
    %c64_i32_67 = arith.constant 64 : i32
    %171 = tpu.dynamic_rotate %168 by %c64_i32_67 dim 1 : vector<8x128xf32>, i32 -> vector<8x128xf32>
    %172 = arith.mulf %169, %154 : vector<8x128xf32>
    %173 = arith.mulf %167, %171 : vector<8x128xf32>
    %174 = arith.addf %172, %173 : vector<8x128xf32>
    %175 = math.tanh %174 : vector<8x128xf32>
    %176 = arith.mulf %170, %175 : vector<8x128xf32>
    %177 = tpu.iota {dimensions = array<i32: 1>} : vector<8x128xi32>
    %c32_i32_68 = arith.constant 32 : i32
    %178 = vector.broadcast %c32_i32_68 : i32 to vector<8x128xi32>
    %179 = arith.cmpi slt, %177, %178 : vector<8x128xi32>
    %cst_69 = arith.constant 0.000000e+00 : f32
    %180 = vector.broadcast %cst_69 : f32 to vector<8x128xf32>
    %181 = arith.select %179, %176, %180 : vector<8x128xi1>, vector<8x128xf32>
    %c32_i32_70 = arith.constant 32 : i32
    %182 = vector.broadcast %c32_i32_70 : i32 to vector<8x128xi32>
    %183 = arith.cmpi slt, %177, %182 : vector<8x128xi32>
    %c4_i32 = arith.constant 4 : i32
    %184 = tpu.dynamic_rotate %176 by %c4_i32 dim 0 : vector<8x128xf32>, i32 -> vector<8x128xf32>
    %cst_71 = arith.constant 0.000000e+00 : f32
    %185 = vector.broadcast %cst_71 : f32 to vector<8x128xf32>
    %186 = arith.select %183, %184, %185 : vector<8x128xi1>, vector<8x128xf32>
    %c32_i32_72 = arith.constant 32 : i32
    %187 = tpu.dynamic_rotate %186 by %c32_i32_72 dim 1 : vector<8x128xf32>, i32 -> vector<8x128xf32>
    %188 = arith.addf %181, %187 : vector<8x128xf32>
    %189 = arith.subf %181, %186 : vector<8x128xf32>
    %190 = math.absf %189 : vector<8x128xf32>
    %c64_i32_73 = arith.constant 64 : i32
    %191 = tpu.dynamic_rotate %190 by %c64_i32_73 dim 1 : vector<8x128xf32>, i32 -> vector<8x128xf32>
    %192 = arith.addf %188, %191 : vector<8x128xf32>
    %193 = arith.mulf %181, %186 : vector<8x128xf32>
    %c96_i32_74 = arith.constant 96 : i32
    %194 = tpu.dynamic_rotate %193 by %c96_i32_74 dim 1 : vector<8x128xf32>, i32 -> vector<8x128xf32>
    %195 = arith.addf %192, %194 : vector<8x128xf32>
    %c0_75 = arith.constant 0 : index
    %c0_76 = arith.constant 0 : index
    %196 = vector.load %arg7[%c0_75, %c0_76] : memref<128x32xf32, #tpu.memory_space<vmem>>, vector<128x32xf32>
    %cst_77 = arith.constant dense<0.000000e+00> : vector<8x32xf32>
    %197 = tpu.matmul %195, %196, %cst_77 {dimension_numbers = #tpu.dot_dimension_numbers<[1], [0], [0], [1], [0, 0, 1, 1], [], []>} : vector<8x128xf32>, vector<128x32xf32>, vector<8x32xf32> -> vector<8x32xf32>
    %c0_78 = arith.constant 0 : index
    %c0_79 = arith.constant 0 : index
    %198 = vector.load %arg8[%c0_78, %c0_79] : memref<1x32xf32, #tpu.memory_space<vmem>>, vector<1x32xf32>
    %199 = vector.broadcast %198 : vector<1x32xf32> to vector<8x32xf32>
    %200 = arith.addf %197, %199 : vector<8x32xf32>
    %c0_80 = arith.constant 0 : index
    %c0_81 = arith.constant 0 : index
    %c0_82 = arith.constant 0 : index
    %201 = vector.load %arg9[%c0_80, %c0_81, %c0_82] : memref<2x32x32xf32, #tpu.memory_space<vmem>>, vector<1x32x32xf32>
    %202 = vector.shape_cast %201 : vector<1x32x32xf32> to vector<32x32xf32>
    %cst_83 = arith.constant dense<0.000000e+00> : vector<8x32xf32>
    %203 = tpu.matmul %200, %202, %cst_83 {dimension_numbers = #tpu.dot_dimension_numbers<[1], [0], [0], [1], [0, 0, 1, 1], [], []>} : vector<8x32xf32>, vector<32x32xf32>, vector<8x32xf32> -> vector<8x32xf32>
    %c0_84 = arith.constant 0 : index
    %c0_85 = arith.constant 0 : index
    %c0_86 = arith.constant 0 : index
    %204 = vector.load %arg10[%c0_84, %c0_85, %c0_86] : memref<2x1x32xf32, #tpu.memory_space<vmem>>, vector<1x1x32xf32>
    %205 = vector.shape_cast %204 : vector<1x1x32xf32> to vector<1x32xf32>
    %206 = vector.broadcast %205 : vector<1x32xf32> to vector<8x32xf32>
    %207 = arith.addf %203, %206 : vector<8x32xf32>
    %cst_87 = arith.constant 0.000000e+00 : f32
    %208 = vector.broadcast %cst_87 : f32 to vector<8x32xf32>
    %209 = arith.maximumf %207, %208 : vector<8x32xf32>
    %c1 = arith.constant 1 : index
    %c0_88 = arith.constant 0 : index
    %c0_89 = arith.constant 0 : index
    %210 = vector.load %arg9[%c1, %c0_88, %c0_89] : memref<2x32x32xf32, #tpu.memory_space<vmem>>, vector<1x32x32xf32>
    %211 = vector.shape_cast %210 : vector<1x32x32xf32> to vector<32x32xf32>
    %cst_90 = arith.constant dense<0.000000e+00> : vector<8x32xf32>
    %212 = tpu.matmul %209, %211, %cst_90 {dimension_numbers = #tpu.dot_dimension_numbers<[1], [0], [0], [1], [0, 0, 1, 1], [], []>} : vector<8x32xf32>, vector<32x32xf32>, vector<8x32xf32> -> vector<8x32xf32>
    %c1_91 = arith.constant 1 : index
    %c0_92 = arith.constant 0 : index
    %c0_93 = arith.constant 0 : index
    %213 = vector.load %arg10[%c1_91, %c0_92, %c0_93] : memref<2x1x32xf32, #tpu.memory_space<vmem>>, vector<1x1x32xf32>
    %214 = vector.shape_cast %213 : vector<1x1x32xf32> to vector<1x32xf32>
    %215 = vector.broadcast %214 : vector<1x32xf32> to vector<8x32xf32>
    %216 = arith.addf %212, %215 : vector<8x32xf32>
    %cst_94 = arith.constant 0.000000e+00 : f32
    %217 = vector.broadcast %cst_94 : f32 to vector<8x32xf32>
    %218 = arith.maximumf %216, %217 : vector<8x32xf32>
    %c0_95 = arith.constant 0 : index
    %c0_96 = arith.constant 0 : index
    %219 = vector.load %arg11[%c0_95, %c0_96] : memref<32x3xf32, #tpu.memory_space<vmem>>, vector<32x3xf32>
    %cst_97 = arith.constant dense<0.000000e+00> : vector<8x3xf32>
    %220 = tpu.matmul %218, %219, %cst_97 {dimension_numbers = #tpu.dot_dimension_numbers<[1], [0], [0], [1], [0, 0, 1, 1], [], []>} : vector<8x32xf32>, vector<32x3xf32>, vector<8x3xf32> -> vector<8x3xf32>
    %c0_98 = arith.constant 0 : index
    %c0_99 = arith.constant 0 : index
    %221 = vector.load %arg12[%c0_98, %c0_99] : memref<1x3xf32, #tpu.memory_space<vmem>>, vector<1x3xf32>
    %222 = vector.broadcast %221 : vector<1x3xf32> to vector<8x3xf32>
    %223 = arith.addf %220, %222 : vector<8x3xf32>
    %224 = vector.extract_strided_slice %223 {offsets = [0, 0], sizes = [4, 3], strides = [1, 1]} : vector<8x3xf32> to vector<4x3xf32>
    %c0_100 = arith.constant 0 : index
    %c0_101 = arith.constant 0 : index
    %225 = vector.load %arg13[%c0_100, %c0_101] : memref<4x3xf32, #tpu.memory_space<vmem>>, vector<4x3xf32>
    tpu.vector_store %arg13[%c0_100, %c0_101], %224 {strides = array<i32>} : memref<4x3xf32, #tpu.memory_space<vmem>>, vector<4x3xf32>,
    return
  }
  func.func @transform_0(%arg0: i32) -> (i32, i32) {
    %c0_i32 = arith.constant 0 : i32
    %c0_i32_0 = arith.constant 0 : i32
    %c0_i32_1 = arith.constant 0 : i32
    return %c0_i32, %c0_i32_0 : i32, i32
  }
  func.func @transform_1(%arg0: i32) -> (i32, i32) {
    %c0_i32 = arith.constant 0 : i32
    %c0_i32_0 = arith.constant 0 : i32
    %c0_i32_1 = arith.constant 0 : i32
    return %c0_i32, %c0_i32_0 : i32, i32
  }
  func.func @transform_2(%arg0: i32) -> (i32, i32) {
    %c0_i32 = arith.constant 0 : i32
    %c0_i32_0 = arith.constant 0 : i32
    %c0_i32_1 = arith.constant 0 : i32
    return %c0_i32, %c0_i32_0 : i32, i32
  }
  func.func @transform_3(%arg0: i32) -> (i32, i32) {
    %c0_i32 = arith.constant 0 : i32
    %c0_i32_0 = arith.constant 0 : i32
    %c0_i32_1 = arith.constant 0 : i32
    return %c0_i32, %c0_i32_0 : i32, i32
  }
  func.func @transform_4(%arg0: i32) -> (i32, i32) {
    %c0_i32 = arith.constant 0 : i32
    %c0_i32_0 = arith.constant 0 : i32
    %c0_i32_1 = arith.constant 0 : i32
    return %c0_i32, %c0_i32_0 : i32, i32
  }
  func.func @transform_5(%arg0: i32) -> (i32, i32) {
    %c0_i32 = arith.constant 0 : i32
    %c0_i32_0 = arith.constant 0 : i32
    %c0_i32_1 = arith.constant 0 : i32
    return %c0_i32, %c0_i32_0 : i32, i32
  }
  func.func @transform_6(%arg0: i32) -> (i32, i32) {
    %c0_i32 = arith.constant 0 : i32
    %c0_i32_0 = arith.constant 0 : i32
    %c0_i32_1 = arith.constant 0 : i32
    return %c0_i32, %c0_i32_0 : i32, i32
  }
  func.func @transform_7(%arg0: i32) -> (i32, i32) {
    %c0_i32 = arith.constant 0 : i32
    %c0_i32_0 = arith.constant 0 : i32
    %c0_i32_1 = arith.constant 0 : i32
    return %c0_i32, %c0_i32_0 : i32, i32
  }
  func.func @transform_8(%arg0: i32) -> (i32, i32, i32) {
    %c0_i32 = arith.constant 0 : i32
    %c0_i32_0 = arith.constant 0 : i32
    %c0_i32_1 = arith.constant 0 : i32
    %c0_i32_2 = arith.constant 0 : i32
    return %c0_i32, %c0_i32_0, %c0_i32_1 : i32, i32, i32
  }
  func.func @transform_9(%arg0: i32) -> (i32, i32, i32) {
    %c0_i32 = arith.constant 0 : i32
    %c0_i32_0 = arith.constant 0 : i32
    %c0_i32_1 = arith.constant 0 : i32
    %c0_i32_2 = arith.constant 0 : i32
    return %c0_i32, %c0_i32_0, %c0_i32_1 : i32, i32, i32
  }
  func.func @transform_10(%arg0: i32) -> (i32, i32) {
    %c0_i32 = arith.constant 0 : i32
    %c0_i32_0 = arith.constant 0 : i32
    %c0_i32_1 = arith.constant 0 : i32
    return %c0_i32, %c0_i32_0 : i32, i32
  }
  func.func @transform_11(%arg0: i32) -> (i32, i32) {
    %c0_i32 = arith.constant 0 : i32
    %c0_i32_0 = arith.constant 0 : i32
    %c0_i32_1 = arith.constant 0 : i32
    return %c0_i32, %c0_i32_0 : i32, i32
  }
  func.func @transform_12(%arg0: i32) -> (i32, i32) {
    %c0_i32 = arith.constant 0 : i32
    %c0_i32_0 = arith.constant 0 : i32
    %c0_i32_1 = arith.constant 0 : i32
    return %c0_i32, %c0_i32_0 : i32, i32
  }
}

</mosaic_0001>

<bundles_post_ra>
// kernel: tpu_custom_call.1
= control target key start
LH: loop header
LB: loop body
LE: loop exit
PB: predicated region body
PF: predicated region fallthrough
CT: control target
= control target key end

     0   :  { %s2740_s0 = inlined_call_operand.vmem [shape: f32[64,384], index: 0, kind: input, shape index: {}]   ;;  %s2741_s1 = inlined_call_operand.vmem [shape: f32[384,32], index: 1, kind: input, shape index: {}]   ;;  %s2742_s2 = inlined_call_operand.vmem [shape: f32[1,32], index: 2, kind: input, shape index: {}]   ;;  %s2743_s3 = inlined_call_operand.vmem [shape: bf16[32,128], index: 3, kind: input, shape index: {}]   ;;  %s2744_s4 = inlined_call_operand.vmem [shape: bf16[128,128], index: 4, kind: input, shape index: {}]   ;;  %s2745_s5 = inlined_call_operand.vmem [shape: f32[1,128], index: 5, kind: input, shape index: {}]   ;;  %s2746_s6 = inlined_call_operand.vmem [shape: f32[128,32], index: 6, kind: input, shape index: {}]   ;;  %s2747_s7 = inlined_call_operand.vmem [shape: f32[1,32], index: 7, kind: input, shape index: {}]   ;;  %s2748_s8 = inlined_call_operand.vmem [shape: f32[2,32,32], index: 8, kind: input, shape index: {}]   ;;  %s2749_s9 = inlined_call_operand.vmem [shape: f32[2,1,32], index: 9, kind: input, shape index: {}]   ;;  %s2750_s10 = inlined_call_operand.vmem [shape: f32[32,3], index: 10, kind: input, shape index: {}]   ;;  %s2751_s11 = inlined_call_operand.vmem [shape: f32[1,3], index: 11, kind: input, shape index: {}]   ;;  %s2752_s12 = inlined_call_operand.hbm [shape: f32[4,3], index: 12, kind: output, shape index: {}]  }
   0x1   :  { %v83_v0 = vld [vmem:[%s2741_s1 + $0x80] sm:$0xff]  ;;  %v84_v1 = vld [vmem:[%s2741_s1 + $0x88] sm:$0xff]  ;;  %v85_v5 = vld [vmem:[%s2741_s1 + $0x90] sm:$0xff] }
   0x2   :  { %v67_v2 = vld [vmem:[%s2741_s1] sm:$0xff]  ;;  %v1857_v3 = vpack.c.bf16 %v84_v1, %v83_v0  ;;  %v68_v4 = vld [vmem:[%s2741_s1 + $0x8] sm:$0xff]  ;;  %v86_v6 = vld [vmem:[%s2741_s1 + $0x98] sm:$0xff] }
   0x3   :  { %v1859_v7 = vpack.c.bf16 %v68_v4, %v67_v2  ;;  %v1861_v8 = vpack.c.bf16 %v86_v6, %v85_v5  ;;  %v99_v9 = vld [vmem:[%s2741_s1 + $0x100] sm:$0xff]  ;;  %v100_v10 = vld [vmem:[%s2741_s1 + $0x108] sm:$0xff]  ;;  %v69_v11 = vld [vmem:[%s2741_s1 + $0x10] sm:$0xff] }
   0x4   :  { %1858 = vmatprep.subr.bf16.mxu0 %v1857_v3  ;;  %v1889_v12 = vpack.c.bf16 %v100_v10, %v99_v9  ;;  %v70_v13 = vld [vmem:[%s2741_s1 + $0x18] sm:$0xff]  ;;  %v87_v14 = vld [vmem:[%s2741_s1 + $0xa0] sm:$0xff]  ;;  %v88_v15 = vld [vmem:[%s2741_s1 + $0xa8] sm:$0xff] }
   0x5   :  { %1860 = vmatpush3.bf16.msra.mxu0 %v1859_v7  ;;  %v1863_v16 = vpack.c.bf16 %v70_v13, %v69_v11  ;;  %v101_v17 = vld [vmem:[%s2741_s1 + $0x110] sm:$0xff]  ;;  %v102_v18 = vld [vmem:[%s2741_s1 + $0x118] sm:$0xff]  ;;  %v1865_v19 = vpack.c.bf16 %v88_v15, %v87_v14  ;;  %v71_v21 = vld [vmem:[%s2741_s1 + $0x20] sm:$0xff] }
   0x6   :  { %1862 = vmatprep.subr.bf16.mxu0 %v1861_v8  ;;  %1890 = vmatprep.subr.bf16.mxu1 %v1889_v12  ;;  %v1893_v20 = vpack.c.bf16 %v102_v18, %v101_v17  ;;  %v72_v22 = vld [vmem:[%s2741_s1 + $0x28] sm:$0xff]  ;;  %v89_v23 = vld [vmem:[%s2741_s1 + $0xb0] sm:$0xff]  ;;  %v90_v24 = vld [vmem:[%s2741_s1 + $0xb8] sm:$0xff] }
   0x7   :  { %1892 = vmatpush3.bf16.msra.mxu1 %v1889_v12  ;;  %v103_v25 = vld [vmem:[%s2741_s1 + $0x120] sm:$0xff]  ;;  %v104_v26 = vld [vmem:[%s2741_s1 + $0x128] sm:$0xff]  ;;  %v1867_v28 = vpack.c.bf16 %v72_v22, %v71_v21  ;;  %v105_v29 = vld [vmem:[%s2741_s1 + $0x130] sm:$0xff]  ;;  %v1869_v31 = vpack.c.bf16 %v90_v24, %v89_v23 }
   0x8   :  { %1894 = vmatprep.subr.bf16.mxu1 %v1893_v20  ;;  %v1897_v27 = vpack.c.bf16 %v104_v26, %v103_v25  ;;  %v106_v30 = vld [vmem:[%s2741_s1 + $0x138] sm:$0xff]  ;;  %v73_v32 = vld [vmem:[%s2741_s1 + $0x30] sm:$0xff]  ;;  %v91_v34 = vld [vmem:[%s2741_s1 + $0xc0] sm:$0xff] }
   0x9   :  { %1864 = vmatpush3.bf16.msra.mxu0 %v1863_v16  ;;  %v74_v33 = vld [vmem:[%s2741_s1 + $0x38] sm:$0xff]  ;;  %v92_v35 = vld [vmem:[%s2741_s1 + $0xc8] sm:$0xff]  ;;  %v1901_v36 = vpack.c.bf16 %v106_v30, %v105_v29  ;;  %v107_v38 = vld [vmem:[%s2741_s1 + $0x140] sm:$0xff] }
   0xa   :  { %1866 = vmatprep.subr.bf16.mxu0 %v1865_v19  ;;  %v1871_v37 = vpack.c.bf16 %v74_v33, %v73_v32  ;;  %v108_v39 = vld [vmem:[%s2741_s1 + $0x148] sm:$0xff]  ;;  %v1873_v40 = vpack.c.bf16 %v92_v35, %v91_v34  ;;  %v75_v41 = vld [vmem:[%s2741_s1 + $0x40] sm:$0xff]  ;;  %v93_v43 = vld [vmem:[%s2741_s1 + $0xd0] sm:$0xff] }
   0xb   :  { %1896 = vmatpush3.bf16.msra.mxu1 %v1893_v20  ;;  %v76_v42 = vld [vmem:[%s2741_s1 + $0x48] sm:$0xff]  ;;  %v94_v44 = vld [vmem:[%s2741_s1 + $0xd8] sm:$0xff]  ;;  %v1905_v45 = vpack.c.bf16 %v108_v39, %v107_v38  ;;  %v109_v48 = vld [vmem:[%s2741_s1 + $0x150] sm:$0xff] }
   0xc   :  { %1898 = vmatprep.subr.bf16.mxu1 %v1897_v27  ;;  %v44_v46 = vld [vmem:[%s2740_s0 + $0x8] sm:$0xff]  ;;  %v1875_v47 = vpack.c.bf16 %v76_v42, %v75_v41  ;;  %v110_v49 = vld [vmem:[%s2741_s1 + $0x158] sm:$0xff]  ;;  %v1877_v50 = vpack.c.bf16 %v94_v44, %v93_v43  ;;  %v77_v51 = vld [vmem:[%s2741_s1 + $0x50] sm:$0xff] }
   0xd   :  { %1868 = vmatpush3.bf16.msra.mxu0 %v1867_v28  ;;  %186 = vmatprep.mubr.f32.mxu0 %v44_v46  ;;  %v78_v52 = vld [vmem:[%s2741_s1 + $0x58] sm:$0xff]  ;;  %v45_v53 = vld [vmem:[%s2740_s0 + $0x10] sm:$0xff]  ;;  %v95_v54 = vld [vmem:[%s2741_s1 + $0xe0] sm:$0xff]  ;;  %v1909_v56 = vpack.c.bf16 %v110_v49, %v109_v48 }
   0xe   :  { %1870 = vmatprep.subr.bf16.mxu0 %v1869_v31  ;;  %v96_v55 = vld [vmem:[%s2741_s1 + $0xe8] sm:$0xff]  ;;  %1605 = vmatprep.mubr.f32.mxu1 %v45_v53  ;;  %v79_v57 = vld [vmem:[%s2741_s1 + $0x60] sm:$0xff]  ;;  %v1879_v60 = vpack.c.bf16 %v78_v52, %v77_v51  ;;  %v97_v61 = vld [vmem:[%s2741_s1 + $0xf0] sm:$0xff] }
   0xf   :  { %1900 = vmatpush3.bf16.msra.mxu1 %v1897_v27  ;;  %v80_v58 = vld [vmem:[%s2741_s1 + $0x68] sm:$0xff]  ;;  %v111_v59 = vld [vmem:[%s2741_s1 + $0x160] sm:$0xff]  ;;  %v1881_v63 = vpack.c.bf16 %v96_v55, %v95_v54  ;;  %v98_v0 = vld [vmem:[%s2741_s1 + $0xf8] sm:$0xff] }
  0x10   :  { %1902 = vmatprep.subr.bf16.mxu1 %v1901_v36  ;;  %v112_v62 = vld [vmem:[%s2741_s1 + $0x168] sm:$0xff]  ;;  %v113_v1 = vld [vmem:[%s2741_s1 + $0x170] sm:$0xff]  ;;  %v114_v2 = vld [vmem:[%s2741_s1 + $0x178] sm:$0xff]  ;;  %v1883_v6 = vpack.c.bf16 %v80_v58, %v79_v57  ;;  %v1885_v7 = vpack.c.bf16 %v98_v0, %v97_v61 }
  0x11   :  { %1872 = vmatpush3.bf16.msra.mxu0 %v1871_v37  ;;  %v1913_v3 = vpack.c.bf16 %v112_v62, %v111_v59  ;;  %v81_v4 = vld [vmem:[%s2741_s1 + $0x70] sm:$0xff]  ;;  %v82_v5 = vld [vmem:[%s2741_s1 + $0x78] sm:$0xff]  ;;  %v1917_v8 = vpack.c.bf16 %v114_v2, %v113_v1 }
  0x12   :  { %1874 = vmatprep.subr.bf16.mxu0 %v1873_v40 }
  0x13   :  { %1904 = vmatpush3.bf16.msra.mxu1 %v1901_v36 }
  0x14   :  { %1906 = vmatprep.subr.bf16.mxu1 %v1905_v45 }
  0x15   :  { %1876 = vmatpush3.bf16.msra.mxu0 %v1875_v47 }
  0x16   :  { %1878 = vmatprep.subr.bf16.mxu0 %v1877_v50 }
  0x17   :  { %1908 = vmatpush3.bf16.msra.mxu1 %v1905_v45 }
  0x18   :  { %1910 = vmatprep.subr.bf16.mxu1 %v1909_v56 }
  0x19   :  { %1880 = vmatpush3.bf16.msra.mxu0 %v1879_v60 }
  0x1a   :  { %1882 = vmatprep.subr.bf16.mxu0 %v1881_v63 }
  0x1b   :  { %1912 = vmatpush3.bf16.msra.mxu1 %v1909_v56 }
  0x1c   :  { %1914 = vmatprep.subr.bf16.mxu1 %v1913_v3 }
  0x1d   :  { %17 = vsyncpa [#allocation3], 0  ;;  %1884 = vmatpush3.bf16.msra.mxu0 %v1883_v6  ;;  %v1887_v9 = vpack.c.bf16 %v82_v5, %v81_v4  ;;  %v43_v10 = vld [vmem:[%s2740_s0] sm:$0xff]  ;;  %v2053_v13 = vmov 0.0   ;;  %v48_v14 = vld [vmem:[%s2740_s0 + $0x28] sm:$0xff]  ;;  %vm2054_vm0 = vmmov 0  }
  0x1e   :  { %1886 = vmatprep.subr.bf16.mxu0 %v1885_v7  ;;  %v2282_v11 = vld [vmem:[%s2744_s4] sm:$0xff]   ;;  %v46_v16 = vld [vmem:[%s2740_s0 + $0x18] sm:$0xff]  ;;  %v2301_v17 = vld [vmem:[%s2744_s4 + $0x8] sm:$0xff]   ;;  %v2055_v43 = vmov 0   ;;  %vm367_vm1 = vcmask 261120   ;;  %s2056_s19 = smov 32  }
  0x1f   :  { %1916 = vmatpush3.bf16.msra.mxu1 %v1913_v3  ;;  %v47_v12 = vld [vmem:[%s2740_s0 + $0x20] sm:$0xff]  ;;  %v50_v18 = vld [vmem:[%s2740_s0 + $0x38] sm:$0xff]  ;;  %v49_v20 = vld [vmem:[%s2740_s0 + $0x30] sm:$0xff]  ;;  %s2058_s20 = smov 64   ;;  %vm1339_vm3 = vcmask 19456  }
  0x20   :  { %1918 = vmatprep.subr.bf16.mxu1 %v1917_v8  ;;  %v51_v15 = vld [vmem:[%s2740_s0 + $0x40] sm:$0xff]  ;;  %v54_v19 = vld [vmem:[%s2740_s0 + $0x58] sm:$0xff]  ;;  %v53_v21 = vld [vmem:[%s2740_s0 + $0x50] sm:$0xff] }
  0x21   :  { %1888 = vmatpush3.bf16.msra.mxu0 %v1887_v9  ;;  %v52_v22 = vld [vmem:[%s2740_s0 + $0x48] sm:$0xff]  ;;  %v55_v24 = vld [vmem:[%s2740_s0 + $0x60] sm:$0xff]  ;;  %v2330_v25 = vld [vmem:[%s2744_s4 + $0x10] sm:$0xff]  }
  0x22   :  { %1629 = vmatprep.subr.bf16.mxu0 %v2053_v13  ;;  %v56_v23 = vld [vmem:[%s2740_s0 + $0x68] sm:$0xff]  ;;  %v59_v26 = vld [vmem:[%s2740_s0 + $0x80] sm:$0xff]  ;;  %v58_v27 = vld [vmem:[%s2740_s0 + $0x78] sm:$0xff] }
  0x23   :  { %1920 = vmatpush3.bf16.msra.mxu1 %v1917_v8  ;;  %v2343_v28 = vld [vmem:[%s2744_s4 + $0x18] sm:$0xff]   ;;  %v61_v30 = vld [vmem:[%s2740_s0 + $0x90] sm:$0xff]  ;;  %v2356_v31 = vld [vmem:[%s2744_s4 + $0x20] sm:$0xff]  }
  0x24   :  { %187 = vmatmul.mubr.f32.vlgmr.msra.gmra.mrb[0].mxu0 %v43_v10  ;;  %v62_v29 = vld [vmem:[%s2740_s0 + $0x98] sm:$0xff]  ;;  %v57_v32 = vld [vmem:[%s2740_s0 + $0x70] sm:$0xff]  ;;  %v60_v34 = vld [vmem:[%s2740_s0 + $0x88] sm:$0xff] }
  0x25   :  { %191 = vmatprep.mubr.f32.mxu0 %v47_v12  ;;  %1630 = vmatpush3.bf16.msra.mxu0 %v2282_v11  ;;  %v65_v33 = vld [vmem:[%s2740_s0 + $0xb0] sm:$0xff]  ;;  %v64_v35 = vld [vmem:[%s2740_s0 + $0xa8] sm:$0xff]  ;;  %v63_v37 = vld [vmem:[%s2740_s0 + $0xa0] sm:$0xff] }
  0x26   :  { %1606 = vmatmul.mubr.f32.vlgmr.msra.gmra.mrb[0].mxu1 %v48_v14  ;;  %1631 = vmatprep.subr.bf16.mxu0 %v2053_v13  ;;  %v2375_v36 = vld [vmem:[%s2744_s4 + $0x28] sm:$0xff]   ;;  %v1975_v38 = vld [vmem:[%s2743_s3] sm:$0xff]   ;;  %v66_v39 = vld [vmem:[%s2740_s0 + $0xb8] sm:$0xff]  ;;  %s2060_s0 = smov [#allocation2]  }
  0x27   :  { %1608 = vmatprep.mubr.f32.mxu1 %v51_v15  ;;  %v2391_v40 = vld [vmem:[%s2744_s4 + $0x30] sm:$0xff]   ;;  %1617 = vmatprep.subr.bf16.mxu1 %v1975_v38  ;;  %v1978_v41 = vld [vmem:[%s2743_s3 + $0x8] sm:$0xff]   ;;  %v2401_v42 = vld [vmem:[%s2744_s4 + $0x38] sm:$0xff]  }
  0x28   :  { %192 = vmatmul.mubr.f32.gmra.mrb[2].mxu0 %v46_v16  ;;  %1618 = vmatpush3.bf16.msra.mxu1 %v1975_v38  ;;  %v2429_v46 = vld [vmem:[%s2742_s2] ss:$0 sm:$0xff] }
  0x29   :  { %196 = vmatprep.mubr.f32.mxu0 %v50_v18  ;;  %1632 = vmatpush3.bf16.msra.mxu0 %v2301_v17 }
  0x2a   :  { %1609 = vmatmul.mubr.f32.gmra.mrb[2].mxu1 %v54_v19  ;;  %1633 = vmatprep.subr.bf16.mxu0 %v2053_v13 }
  0x2b   :  { %1611 = vmatprep.mubr.f32.mxu1 %v57_v32  ;;  %1619 = vmatprep.subr.bf16.mxu1 %v1978_v41 }
  0x2c   :  { %197 = vmatmul.mubr.f32.gmra.mrb[4].mxu0 %v49_v20  ;;  %1620 = vmatpush3.bf16.msra.mxu1 %v1978_v41 }
  0x2d   :  { %201 = vmatprep.mubr.f32.mxu0 %v53_v21  ;;  %1634 = vmatpush3.bf16.msra.mxu0 %v2330_v25 }
  0x2e   :  { %1635 = vmatprep.subr.bf16.mxu0 %v2053_v13  ;;  %1612 = vmatmul.mubr.f32.gmra.mrb[4].mxu1 %v60_v34 }
  0x2f   :  { %1614 = vmatprep.mubr.f32.mxu1 %v63_v37  ;;  %1649 = vmatprep.subr.bf16.mxu1 %v2053_v13 }
  0x30   :  { %202 = vmatmul.mubr.f32.gmra.mrb[6].mxu0 %v52_v22 }
  0x31   :  { %206 = vmatprep.mubr.f32.mxu0 %v56_v23  ;;  %1636 = vmatpush3.bf16.msra.mxu0 %v2343_v28 }
  0x32   :  { %1637 = vmatprep.subr.bf16.mxu0 %v2053_v13  ;;  %1615 = vmatmul.mubr.f32.gmra.mrb[6].mxu1 %v66_v39 }
  0x34   :  { %207 = vmatmul.mubr.f32.gmra.mrb[8].mxu0 %v55_v24 }
  0x35   :  { %211 = vmatprep.mubr.f32.mxu0 %v59_v26  ;;  %1638 = vmatpush3.bf16.msra.mxu0 %v2356_v31 }
  0x36   :  { %1639 = vmatprep.subr.bf16.mxu0 %v2053_v13 }
  0x38   :  { %212 = vmatmul.mubr.f32.gmra.mrb[10].mxu0 %v58_v27 }
  0x39   :  { %216 = vmatprep.mubr.f32.mxu0 %v62_v29  ;;  %1640 = vmatpush3.bf16.msra.mxu0 %v2375_v36 }
  0x3a   :  { %1641 = vmatprep.subr.bf16.mxu0 %v2053_v13 }
  0x3c   :  { %217 = vmatmul.mubr.f32.gmra.mrb[12].mxu0 %v61_v30 }
  0x3d   :  { %221 = vmatprep.mubr.f32.mxu0 %v65_v33  ;;  %1642 = vmatpush3.bf16.msra.mxu0 %v2391_v40 }
  0x3e   :  { %1643 = vmatprep.subr.bf16.mxu0 %v2053_v13 }
  0x40   :  { %222 = vmatmul.mubr.f32.gmra.mrb[14].mxu0 %v64_v35 }
  0x41   :  { %1644 = vmatpush3.bf16.msra.mxu0 %v2401_v42  ;;  %1645 = vmatprep.mubr.msk.bf16.mxu0 %vm2054_vm0, %v2053_v13 }
  0x42   :  { %1669 = vmatprep.subr.bf16.mxu0 %v2053_v13 }
  0x44   :  { %1646 = vmatmul.mubr.bf16.vlgmr.msra.gmra.mrb[16].mxu0 %v2055_v43 }
  0x45   :  { %1670 = vmatpush3.bf16.msra.mxu0 %v2282_v11  ;;  %1685 = vmatprep.mubr.msk.bf16.mxu0 %vm2054_vm0, %v2053_v13 }
  0x46   :  { %1671 = vmatprep.subr.bf16.mxu0 %v2053_v13 }
  0x49   :  { %1672 = vmatpush3.bf16.msra.mxu0 %v2301_v17 }
  0x4a   :  { %1673 = vmatprep.subr.bf16.mxu0 %v2053_v13 }
  0x4d   :  { %1674 = vmatpush3.bf16.msra.mxu0 %v2330_v25 }
  0x4e   :  { %1675 = vmatprep.subr.bf16.mxu0 %v2053_v13 }
  0x51   :  { %1676 = vmatpush3.bf16.msra.mxu0 %v2343_v28 }
  0x52   :  { %1677 = vmatprep.subr.bf16.mxu0 %v2053_v13 }
  0x55   :  { %1678 = vmatpush3.bf16.msra.mxu0 %v2356_v31 }
  0x56   :  { %1679 = vmatprep.subr.bf16.mxu0 %v2053_v13 }
  0x59   :  { %1680 = vmatpush3.bf16.msra.mxu0 %v2375_v36 }
  0x5a   :  { %1681 = vmatprep.subr.bf16.mxu0 %v2053_v13 }
  0x5d   :  { %1682 = vmatpush3.bf16.msra.mxu0 %v2391_v40 }
  0x5e   :  { %1683 = vmatprep.subr.bf16.mxu0 %v2053_v13 }
  0x61   :  { %1684 = vmatpush3.bf16.msra.mxu0 %v2401_v42 }
  0x62   :  { %1709 = vmatprep.subr.bf16.mxu0 %v2053_v13 }
  0xf7   :  { %v1415_v44 = vpop.f32.mrb[0].mxu0 }
  0xf8   :  { %v1416_v45 = vpop.f32.mrb[1].mxu0 }
  0xf9   :  { %v1417_v47 = vadd.f32 %v1416_v45, %v1415_v44  ;;  %v1607_v48 = vpop.f32.mrb[0].mxu1 }
  0xfa   :  { %v293_v49 = vpop.f32.mrb[1].mxu1 }
  0xfb   :  { %v1418_v50 = vpop.f32.mrb[2].mxu0  ;;  %v189_v51 = vadd.f32 %v1417_v47, %v2429_v46 }
  0xfc   :  { %v1419_v52 = vpop.f32.mrb[3].mxu0 }
  0xfd   :  { %v1420_v53 = vadd.f32 %v1419_v52, %v1418_v50  ;;  %v294_v54 = vadd.f32 %v293_v49, %v189_v51  ;;  %v1610_v55 = vpop.f32.mrb[2].mxu1 }
  0xfe   :  { %v303_v56 = vpop.f32.mrb[3].mxu1 }
  0xff   :  { %v194_v57 = vadd.f32 %v1420_v53, %v2429_v46  ;;  %v1421_v58 = vpop.f32.mrb[4].mxu0  ;;  %v332_v62 = vmax.f32 %v294_v54, 0.0 }
 0x100   :  { %v1422_v59 = vpop.f32.mrb[5].mxu0 }
 0x101   :  { %v299_v60 = vadd.f32 %v1607_v48, %v194_v57  ;;  %v1423_v61 = vadd.f32 %v1422_v59, %v1421_v58  ;;  %v1613_v26 = vpop.f32.mrb[4].mxu1 }
 0x102   :  { %v313_v30 = vpop.f32.mrb[5].mxu1 }
 0x103   :  { %v333_v63 = vmax.f32 %v299_v60, 0.0  ;;  %v1424_v0 = vpop.f32.mrb[6].mxu0  ;;  %v199_v1 = vadd.f32 %v1423_v61, %v2429_v46 }
 0x104   :  { %v1425_v2 = vpop.f32.mrb[7].mxu0 }
 0x105   :  { %v340_v3 = vpack.c.bf16 %v333_v63, %v332_v62  ;;  %v1426_v4 = vadd.f32 %v1425_v2, %v1424_v0  ;;  %v304_v5 = vadd.f32 %v303_v56, %v199_v1  ;;  %v1616_v39 = vpop.f32.mrb[6].mxu1 }
 0x106   :  { %v323_v43 = vpop.f32.mrb[7].mxu1 }
 0x107   :  { %v204_v6 = vadd.f32 %v1426_v4, %v2429_v46  ;;  %1621 = vmatprep.mubr.msk.bf16.mxu1 %vm367_vm1, %v340_v3  ;;  %v334_v8 = vmax.f32 %v304_v5, 0.0  ;;  %v1427_v12 = vpop.f32.mrb[8].mxu0 }
 0x108   :  { %v1428_v14 = vpop.f32.mrb[9].mxu0 }
 0x109   :  { %v309_v7 = vadd.f32 %v1610_v55, %v204_v6  ;;  %v1429_v15 = vadd.f32 %v1428_v14, %v1427_v12 }
 0x10b   :  { %v335_v9 = vmax.f32 %v309_v7, 0.0  ;;  %v1430_v16 = vpop.f32.mrb[10].mxu0  ;;  %v209_v23 = vadd.f32 %v1429_v15, %v2429_v46 }
 0x10c   :  { %v1431_v18 = vpop.f32.mrb[11].mxu0 }
 0x10d   :  { %v341_v10 = vpack.c.bf16 %v335_v9, %v334_v8  ;;  %v1432_v19 = vadd.f32 %v1431_v18, %v1430_v16  ;;  %v314_v33 = vadd.f32 %v313_v30, %v209_v23 }
 0x10f   :  { %1622 = vmatmul.mubr.msk.bf16.vlgmr.msra.gmra.mrb[8].mxu1 %vm367_vm1, %v341_v10  ;;  %v1433_v20 = vpop.f32.mrb[12].mxu0  ;;  %v214_v21 = vadd.f32 %v1432_v19, %v2429_v46  ;;  %v336_v38 = vmax.f32 %v314_v33, 0.0 }
 0x110   :  { %1650 = vmatpush3.bf16.msra.mxu1 %v2282_v11  ;;  %v1434_v22 = vpop.f32.mrb[13].mxu0 }
 0x111   :  { %1651 = vmatprep.subr.bf16.mxu1 %v2053_v13  ;;  %v1435_v24 = vadd.f32 %v1434_v22, %v1433_v20  ;;  %v319_v29 = vadd.f32 %v1613_v26, %v214_v21 }
 0x113   :  { %v1436_v27 = vpop.f32.mrb[14].mxu0  ;;  %v219_v34 = vadd.f32 %v1435_v24, %v2429_v46  ;;  %v337_v37 = vmax.f32 %v319_v29, 0.0 }
 0x114   :  { %1652 = vmatpush3.bf16.msra.mxu1 %v2301_v17  ;;  %v1437_v32 = vpop.f32.mrb[15].mxu0 }
 0x115   :  { %1653 = vmatprep.subr.bf16.mxu1 %v2053_v13  ;;  %v1438_v35 = vadd.f32 %v1437_v32, %v1436_v27  ;;  %v342_v44 = vpack.c.bf16 %v337_v37, %v336_v38  ;;  %v324_v45 = vadd.f32 %v323_v43, %v219_v34 }
 0x117   :  { %v224_v41 = vadd.f32 %v1438_v35, %v2429_v46  ;;  %v338_v48 = vmax.f32 %v324_v45, 0.0  ;;  %1625 = vmatprep.mubr.msk.bf16.mxu1 %vm367_vm1, %v342_v44  ;;  %v543_v51 = vpop.f32.mrb[16].mxu0  ;;  %v2464_v46 = vld [vmem:[%s2745_s5] ss:$0 sm:$0xff]  ;;  %s2057_s5 = smov 96  }
 0x118   :  { %1654 = vmatpush3.bf16.msra.mxu1 %v2330_v25  ;;  %v1647_v52 = vpop.f32.mrb[17].mxu0 }
 0x119   :  { %1655 = vmatprep.subr.bf16.mxu1 %v2053_v13  ;;  %v329_v47 = vadd.f32 %v1616_v39, %v224_v41  ;;  %v546_v53 = vpop.f32.mrb[18].mxu0 }
 0x11a   :  { %v1648_v54 = vpop.f32.mrb[19].mxu0 }
 0x11b   :  { %v339_v49 = vmax.f32 %v329_v47, 0.0 }
 0x11c   :  { %1656 = vmatpush3.bf16.msra.mxu1 %v2343_v28 }
 0x11d   :  { %1657 = vmatprep.subr.bf16.mxu1 %v2053_v13  ;;  %v343_v50 = vpack.c.bf16 %v339_v49, %v338_v48 }
 0x11f   :  { %1626 = vmatmul.mubr.msk.bf16.gmra.mrb[12].mxu1 %vm367_vm1, %v343_v50 }
 0x120   :  { %1658 = vmatpush3.bf16.msra.mxu1 %v2356_v31  ;;  %1665 = vmatprep.mubr.msk.bf16.mxu1 %vm2054_vm0, %v2053_v13 }
 0x121   :  { %1659 = vmatprep.subr.bf16.mxu1 %v2053_v13 }
 0x124   :  { %1660 = vmatpush3.bf16.msra.mxu1 %v2375_v36 }
 0x125   :  { %1661 = vmatprep.subr.bf16.mxu1 %v2053_v13 }
 0x128   :  { %1662 = vmatpush3.bf16.msra.mxu1 %v2391_v40 }
 0x129   :  { %1663 = vmatprep.subr.bf16.mxu1 %v2053_v13 }
 0x12c   :  { %1664 = vmatpush3.bf16.msra.mxu1 %v2401_v42 }
 0x12d   :  { %1689 = vmatprep.subr.bf16.mxu1 %v2053_v13 }
 0x1e2   :  { %v2466_v55 = vpop.f32.mrb[8].mxu1 }
 0x1e3   :  { %v414_v56 = vpop.f32.mrb[9].mxu1  ;;  %v423_v44 = vadd.f32 %v2466_v55, %v2464_v46 }
 0x1e4   :  { %v415_v57 = vadd.f32 %v2464_v46, %v414_v56  ;;  %v2469_v58 = vpop.f32.mrb[10].mxu1 }
 0x1e5   :  { %v417_v59 = vpop.f32.mrb[11].mxu1 }
 0x1e6   :  { %v549_v60 = vadd.f32 %v543_v51, %v415_v57  ;;  %v418_v18 = vadd.f32 %v2464_v46, %v417_v59 }
 0x1e8   :  { %v550_v61 = vmul.f32 0.5, %v549_v60 }
 0x1ea   :  { %1981 = vtanh.f32 %v550_v61 }
 0x1eb   :  { %1983 = vtanh.f32 %v549_v60 }
 0x1f2   :  { %v2474_v2 = vpop.f32.mrb[12].mxu1 }
 0x1f3   :  { %v2476_v3 = vpop.f32.mrb[13].mxu1 }
 0x1f4   :  { %v1982_v62 = vpop.eup %1981  ;;  %v2478_v4 = vpop.f32.mrb[14].mxu1 }
 0x1f5   :  { %v552_v63 = vadd.f32 1.0, %v1982_v62  ;;  %v1984_v1 = vpop.eup %1983  ;;  %v2480_v5 = vpop.f32.mrb[15].mxu1 }
 0x1f7   :  { %v553_v0 = vmul.f32 0.5, %v552_v63 }
 0x1f9   :  { %557 = vrot.lane.b32.xlu1 %v553_v0, %s2056_s19  ;;  %555 = vrot.lane.b32.xlu0 %v553_v0, %s2057_s5 }
 0x1fd   :  { %559 = vrot.lane.b32.xlu0 %v1984_v1, %s2058_s20 }
 0x26b   :  { %v556_v6 = vpop.permute.xlu0 %555  ;;  %v558_v14 = vpop.permute.xlu1 %557 }
 0x26c   :  { %v561_v8 = vmul.f32 0.0, %v556_v6  ;;  %v426_v6 = vadd.f32 %v2469_v58, %v2464_v46 }
 0x26f   :  { %v560_v7 = vpop.permute.xlu0 %559 }
 0x270   :  { %v562_v9 = vmul.f32 %v560_v7, %v553_v0 }
 0x272   :  { %v563_v10 = vadd.f32 %v562_v9, %v561_v8 }
 0x274   :  { %1985 = vtanh.f32 %v563_v10 }
 0x27e   :  { %v1986_v12 = vpop.eup %1985 }
 0x27f   :  { %v565_v15 = vmul.f32 %v1986_v12, %v558_v14 }
 0x281   :  { %v566_v16 = vpack.c.bf16 %v565_v15, %v565_v15 }
 0x283   :  { %1666 = vmatmul.mubr.bf16.vlgmr.msra.gmra.mrb[16].mxu1 %v566_v16 }
 0x284   :  { %1690 = vmatpush3.bf16.msra.mxu1 %v2282_v11  ;;  %1705 = vmatprep.mubr.msk.bf16.mxu1 %vm2054_vm0, %v2053_v13 }
 0x285   :  { %1691 = vmatprep.subr.bf16.mxu1 %v2053_v13 }
 0x288   :  { %1692 = vmatpush3.bf16.msra.mxu1 %v2301_v17 }
 0x289   :  { %1693 = vmatprep.subr.bf16.mxu1 %v2053_v13 }
 0x28c   :  { %1694 = vmatpush3.bf16.msra.mxu1 %v2330_v25 }
 0x28d   :  { %1695 = vmatprep.subr.bf16.mxu1 %v2053_v13 }
 0x290   :  { %1696 = vmatpush3.bf16.msra.mxu1 %v2343_v28 }
 0x291   :  { %1697 = vmatprep.subr.bf16.mxu1 %v2053_v13 }
 0x294   :  { %1698 = vmatpush3.bf16.msra.mxu1 %v2356_v31 }
 0x295   :  { %1699 = vmatprep.subr.bf16.mxu1 %v2053_v13 }
 0x298   :  { %1700 = vmatpush3.bf16.msra.mxu1 %v2375_v36 }
 0x299   :  { %1701 = vmatprep.subr.bf16.mxu1 %v2053_v13 }
 0x29c   :  { %1702 = vmatpush3.bf16.msra.mxu1 %v2391_v40 }
 0x29d   :  { %1703 = vmatprep.subr.bf16.mxu1 %v2053_v13 }
 0x2a0   :  { %1704 = vmatpush3.bf16.msra.mxu1 %v2401_v42 }
 0x2a1   :  { %1729 = vmatprep.subr.bf16.mxu1 %v2053_v13 }
 0x356   :  { %v601_v19 = vpop.f32.mrb[16].mxu1 }
 0x357   :  { %v607_v20 = vadd.f32 %v601_v19, %v418_v18  ;;  %v1667_v21 = vpop.f32.mrb[17].mxu1 }
 0x358   :  { %v604_v22 = vpop.f32.mrb[18].mxu1 }
 0x359   :  { %v608_v23 = vmul.f32 0.5, %v607_v20  ;;  %1987 = vtanh.f32 %v607_v20  ;;  %v1668_v24 = vpop.f32.mrb[19].mxu1 }
 0x35b   :  { %1989 = vtanh.f32 %v608_v23 }
 0x363   :  { %v1988_v26 = vpop.eup %1987 }
 0x364   :  { %617 = vrot.lane.b32.xlu0 %v1988_v26, %s2058_s20 }
 0x365   :  { %v1990_v27 = vpop.eup %1989 }
 0x366   :  { %v610_v29 = vadd.f32 1.0, %v1990_v27 }
 0x368   :  { %v611_v30 = vmul.f32 0.5, %v610_v29 }
 0x36a   :  { %613 = vrot.lane.b32.xlu1 %v611_v30, %s2057_s5 }
 0x36e   :  { %615 = vrot.lane.b32.xlu1 %v611_v30, %s2056_s19 }
 0x3d6   :  { %v618_v32 = vpop.permute.xlu0 %617 }
 0x3d7   :  { %v620_v34 = vmul.f32 %v618_v32, %v611_v30  ;;  %v431_v30 = vadd.f32 %v2464_v46, %v2476_v3 }
 0x3dc   :  { %v614_v33 = vpop.permute.xlu1 %613 }
 0x3dd   :  { %v619_v35 = vmul.f32 %v614_v33, %v563_v10 }
 0x3df   :  { %v621_v37 = vadd.f32 %v620_v34, %v619_v35 }
 0x3e0   :  { %v616_v39 = vpop.permute.xlu1 %615 }
 0x3e1   :  { %1991 = vtanh.f32 %v621_v37 }
 0x3eb   :  { %v1992_v38 = vpop.eup %1991 }
 0x3ec   :  { %v623_v41 = vmul.f32 %v1992_v38, %v616_v39 }
 0x3ee   :  { %v624_v43 = vpack.c.bf16 %v623_v41, %v623_v41 }
 0x3f0   :  { %1686 = vmatmul.mubr.bf16.vlgmr.msra.gmra.mrb[20].mxu0 %v624_v43 }
 0x3f1   :  { %1710 = vmatpush3.bf16.msra.mxu0 %v2282_v11  ;;  %1725 = vmatprep.mubr.msk.bf16.mxu0 %vm2054_vm0, %v2053_v13 }
 0x3f2   :  { %1711 = vmatprep.subr.bf16.mxu0 %v2053_v13 }
 0x3f5   :  { %1712 = vmatpush3.bf16.msra.mxu0 %v2301_v17 }
 0x3f6   :  { %1713 = vmatprep.subr.bf16.mxu0 %v2053_v13 }
 0x3f9   :  { %1714 = vmatpush3.bf16.msra.mxu0 %v2330_v25 }
 0x3fa   :  { %1715 = vmatprep.subr.bf16.mxu0 %v2053_v13 }
 0x3fd   :  { %1716 = vmatpush3.bf16.msra.mxu0 %v2343_v28 }
 0x3fe   :  { %1717 = vmatprep.subr.bf16.mxu0 %v2053_v13 }
 0x401   :  { %1718 = vmatpush3.bf16.msra.mxu0 %v2356_v31 }
 0x402   :  { %1719 = vmatprep.subr.bf16.mxu0 %v2053_v13 }
 0x405   :  { %1720 = vmatpush3.bf16.msra.mxu0 %v2375_v36 }
 0x406   :  { %1721 = vmatprep.subr.bf16.mxu0 %v2053_v13 }
 0x409   :  { %1722 = vmatpush3.bf16.msra.mxu0 %v2391_v40 }
 0x40a   :  { %1723 = vmatprep.subr.bf16.mxu0 %v2053_v13 }
 0x40d   :  { %1724 = vmatpush3.bf16.msra.mxu0 %v2401_v42 }
 0x40e   :  { %1749 = vmatprep.subr.bf16.mxu0 %v2053_v13 }
 0x4c3   :  { %v659_v45 = vpop.f32.mrb[20].mxu0 }
 0x4c4   :  { %v665_v47 = vadd.f32 %v659_v45, %v423_v44  ;;  %v1687_v48 = vpop.f32.mrb[21].mxu0 }
 0x4c5   :  { %v662_v49 = vpop.f32.mrb[22].mxu0 }
 0x4c6   :  { %v666_v50 = vmul.f32 0.5, %v665_v47  ;;  %1993 = vtanh.f32 %v665_v47  ;;  %v1688_v51 = vpop.f32.mrb[23].mxu0 }
 0x4c8   :  { %1995 = vtanh.f32 %v666_v50 }
 0x4d0   :  { %v1994_v52 = vpop.eup %1993 }
 0x4d1   :  { %675 = vrot.lane.b32.xlu1 %v1994_v52, %s2058_s20 }
 0x4d2   :  { %v1996_v53 = vpop.eup %1995 }
 0x4d3   :  { %v668_v54 = vadd.f32 1.0, %v1996_v53 }
 0x4d5   :  { %v669_v56 = vmul.f32 0.5, %v668_v54 }
 0x4d7   :  { %671 = vrot.lane.b32.xlu0 %v669_v56, %s2057_s5 }
 0x4db   :  { %673 = vrot.lane.b32.xlu0 %v669_v56, %s2056_s19 }
 0x543   :  { %v676_v57 = vpop.permute.xlu1 %675 }
 0x544   :  { %v678_v59 = vmul.f32 %v676_v57, %v669_v56 }
 0x549   :  { %v672_v55 = vpop.permute.xlu0 %671 }
 0x54a   :  { %v677_v60 = vmul.f32 %v672_v55, %v621_v37 }
 0x54c   :  { %v679_v61 = vadd.f32 %v678_v59, %v677_v60 }
 0x54d   :  { %v674_v63 = vpop.permute.xlu0 %673 }
 0x54e   :  { %1997 = vtanh.f32 %v679_v61 }
 0x558   :  { %v1998_v62 = vpop.eup %1997 }
 0x559   :  { %v681_v0 = vmul.f32 %v1998_v62, %v674_v63 }
 0x55b   :  { %v682_v1 = vpack.c.bf16 %v681_v0, %v681_v0 }
 0x55d   :  { %1706 = vmatmul.mubr.bf16.vlgmr.msra.gmra.mrb[20].mxu1 %v682_v1 }
 0x55e   :  { %1730 = vmatpush3.bf16.msra.mxu1 %v2282_v11  ;;  %1745 = vmatprep.mubr.msk.bf16.mxu1 %vm2054_vm0, %v2053_v13 }
 0x55f   :  { %1731 = vmatprep.subr.bf16.mxu1 %v2053_v13 }
 0x562   :  { %1732 = vmatpush3.bf16.msra.mxu1 %v2301_v17 }
 0x563   :  { %1733 = vmatprep.subr.bf16.mxu1 %v2053_v13 }
 0x566   :  { %1734 = vmatpush3.bf16.msra.mxu1 %v2330_v25 }
 0x567   :  { %1735 = vmatprep.subr.bf16.mxu1 %v2053_v13 }
 0x56a   :  { %1736 = vmatpush3.bf16.msra.mxu1 %v2343_v28 }
 0x56b   :  { %1737 = vmatprep.subr.bf16.mxu1 %v2053_v13 }
 0x56e   :  { %1738 = vmatpush3.bf16.msra.mxu1 %v2356_v31 }
 0x56f   :  { %1739 = vmatprep.subr.bf16.mxu1 %v2053_v13 }
 0x572   :  { %1740 = vmatpush3.bf16.msra.mxu1 %v2375_v36 }
 0x573   :  { %1741 = vmatprep.subr.bf16.mxu1 %v2053_v13 }
 0x576   :  { %1742 = vmatpush3.bf16.msra.mxu1 %v2391_v40 }
 0x577   :  { %1743 = vmatprep.subr.bf16.mxu1 %v2053_v13 }
 0x57a   :  { %1744 = vmatpush3.bf16.msra.mxu1 %v2401_v42 }
 0x57b   :  { %1769 = vmatprep.subr.bf16.mxu1 %v2053_v13 }
 0x630   :  { %v717_v7 = vpop.f32.mrb[20].mxu1 }
 0x631   :  { %v723_v8 = vadd.f32 %v717_v7, %v426_v6  ;;  %v1707_v9 = vpop.f32.mrb[21].mxu1  ;;  %v439_v6 = vadd.f32 %v2474_v2, %v2464_v46 }
 0x632   :  { %v720_v10 = vpop.f32.mrb[22].mxu1 }
 0x633   :  { %v724_v12 = vmul.f32 0.5, %v723_v8  ;;  %1999 = vtanh.f32 %v723_v8  ;;  %v1708_v14 = vpop.f32.mrb[23].mxu1 }
 0x635   :  { %2001 = vtanh.f32 %v724_v12 }
 0x63d   :  { %v2000_v15 = vpop.eup %1999 }
 0x63e   :  { %733 = vrot.lane.b32.xlu0 %v2000_v15, %s2058_s20 }
 0x63f   :  { %v2002_v16 = vpop.eup %2001 }
 0x640   :  { %v726_v18 = vadd.f32 1.0, %v2002_v16 }
 0x642   :  { %v727_v19 = vmul.f32 0.5, %v726_v18 }
 0x644   :  { %729 = vrot.lane.b32.xlu1 %v727_v19, %s2057_s5 }
 0x648   :  { %731 = vrot.lane.b32.xlu1 %v727_v19, %s2056_s19 }
 0x6b0   :  { %v734_v20 = vpop.permute.xlu0 %733 }
 0x6b1   :  { %v736_v21 = vmul.f32 %v734_v20, %v727_v19 }
 0x6b6   :  { %v730_v58 = vpop.permute.xlu1 %729 }
 0x6b7   :  { %v735_v22 = vmul.f32 %v730_v58, %v679_v61 }
 0x6b9   :  { %v737_v23 = vadd.f32 %v736_v21, %v735_v22 }
 0x6ba   :  { %v732_v26 = vpop.permute.xlu1 %731 }
 0x6bb   :  { %2003 = vtanh.f32 %v737_v23 }
 0x6c5   :  { %v2004_v24 = vpop.eup %2003 }
 0x6c6   :  { %v739_v27 = vmul.f32 %v2004_v24, %v732_v26 }
 0x6c8   :  { %v740_v29 = vpack.c.bf16 %v739_v27, %v739_v27 }
 0x6ca   :  { %1726 = vmatmul.mubr.bf16.vlgmr.msra.gmra.mrb[24].mxu0 %v740_v29  ;;  %v442_v29 = vadd.f32 %v2478_v4, %v2464_v46  ;;  %v991_v4 = vld [vmem:[%s2746_s6 + $0x8] sm:$0xff] }
 0x6cb   :  { %1750 = vmatpush3.bf16.msra.mxu0 %v2282_v11  ;;  %1765 = vmatprep.mubr.msk.bf16.mxu0 %vm2054_vm0, %v2053_v13 }
 0x6cc   :  { %1751 = vmatprep.subr.bf16.mxu0 %v2053_v13 }
 0x6cf   :  { %1752 = vmatpush3.bf16.msra.mxu0 %v2301_v17 }
 0x6d0   :  { %1753 = vmatprep.subr.bf16.mxu0 %v2053_v13 }
 0x6d3   :  { %1754 = vmatpush3.bf16.msra.mxu0 %v2330_v25 }
 0x6d4   :  { %1755 = vmatprep.subr.bf16.mxu0 %v2053_v13 }
 0x6d7   :  { %1756 = vmatpush3.bf16.msra.mxu0 %v2343_v28 }
 0x6d8   :  { %1757 = vmatprep.subr.bf16.mxu0 %v2053_v13 }
 0x6db   :  { %1758 = vmatpush3.bf16.msra.mxu0 %v2356_v31 }
 0x6dc   :  { %1759 = vmatprep.subr.bf16.mxu0 %v2053_v13 }
 0x6df   :  { %1760 = vmatpush3.bf16.msra.mxu0 %v2375_v36 }
 0x6e0   :  { %1761 = vmatprep.subr.bf16.mxu0 %v2053_v13 }
 0x6e3   :  { %1762 = vmatpush3.bf16.msra.mxu0 %v2391_v40 }
 0x6e4   :  { %1763 = vmatprep.subr.bf16.mxu0 %v2053_v13 }
 0x6e7   :  { %1764 = vmatpush3.bf16.msra.mxu0 %v2401_v42 }
 0x79d   :  { %v775_v32 = vpop.f32.mrb[24].mxu0 }
 0x79e   :  { %v781_v33 = vadd.f32 %v775_v32, %v431_v30  ;;  %v1727_v34 = vpop.f32.mrb[25].mxu0 }
 0x79f   :  { %v778_v35 = vpop.f32.mrb[26].mxu0 }
 0x7a0   :  { %v782_v37 = vmul.f32 0.5, %v781_v33  ;;  %2005 = vtanh.f32 %v781_v33  ;;  %v1728_v38 = vpop.f32.mrb[27].mxu0 }
 0x7a2   :  { %2007 = vtanh.f32 %v782_v37 }
 0x7aa   :  { %v2006_v39 = vpop.eup %2005 }
 0x7ab   :  { %791 = vrot.lane.b32.xlu1 %v2006_v39, %s2058_s20 }
 0x7ac   :  { %v2008_v41 = vpop.eup %2007 }
 0x7ad   :  { %v784_v43 = vadd.f32 1.0, %v2008_v41 }
 0x7af   :  { %v785_v44 = vmul.f32 0.5, %v784_v43 }
 0x7b1   :  { %787 = vrot.lane.b32.xlu0 %v785_v44, %s2057_s5 }
 0x7b5   :  { %789 = vrot.lane.b32.xlu0 %v785_v44, %s2056_s19 }
 0x81d   :  { %v792_v45 = vpop.permute.xlu1 %791 }
 0x81e   :  { %v794_v47 = vmul.f32 %v792_v45, %v785_v44  ;;  %v992_v44 = vld [vmem:[%s2746_s6 + $0x10] sm:$0xff]  ;;  %v2059_v45 = vmov 0.0|0.0  }
 0x81f   :  { %1921 = vmatprep.subr.bf16.mxu0 %v2059_v45 }
 0x823   :  { %v788_v3 = vpop.permute.xlu0 %787 }
 0x824   :  { %v793_v48 = vmul.f32 %v788_v3, %v737_v23 }
 0x826   :  { %v795_v49 = vadd.f32 %v794_v47, %v793_v48  ;;  %v993_v47 = vld [vmem:[%s2746_s6 + $0x18] sm:$0xff] }
 0x827   :  { %v790_v51 = vpop.permute.xlu0 %789  ;;  %v1925_v48 = vpack.c.bf16 %v993_v47, %v992_v44  ;;  %v1372_v44 = vld [vmem:[%s2749_s9] ss:$0 sm:$0xff] }
 0x828   :  { %2009 = vtanh.f32 %v795_v49 }
 0x832   :  { %v2010_v50 = vpop.eup %2009 }
 0x833   :  { %v797_v52 = vmul.f32 %v2010_v50, %v790_v51  ;;  %v995_v50 = vld [vmem:[%s2746_s6 + $0x28] sm:$0xff] }
 0x835   :  { %v798_v53 = vpack.c.bf16 %v797_v52, %v797_v52  ;;  %v996_v52 = vld [vmem:[%s2746_s6 + $0x30] sm:$0xff] }
 0x837   :  { %1746 = vmatmul.mubr.bf16.vlgmr.msra.gmra.mrb[24].mxu1 %v798_v53  ;;  %v997_v53 = vld [vmem:[%s2746_s6 + $0x38] sm:$0xff] }
 0x838   :  { %1770 = vmatpush3.bf16.msra.mxu1 %v2282_v11  ;;  %1785 = vmatprep.mubr.msk.bf16.mxu1 %vm2054_vm0, %v2053_v13  ;;  %v434_v11 = vadd.f32 %v2464_v46, %v2480_v5  ;;  %v990_v46 = vld [vmem:[%s2746_s6] sm:$0xff] }
 0x839   :  { %1771 = vmatprep.subr.bf16.mxu1 %v2053_v13  ;;  %v1922_v3 = vpack.c.bf16 %v991_v4, %v990_v46  ;;  %v1255_v46 = vld [vmem:[%s2750_s10] sm:$0xff] }
 0x83c   :  { %1772 = vmatpush3.bf16.msra.mxu1 %v2301_v17 }
 0x83d   :  { %1773 = vmatprep.subr.bf16.mxu1 %v2053_v13 }
 0x840   :  { %1774 = vmatpush3.bf16.msra.mxu1 %v2330_v25 }
 0x841   :  { %1775 = vmatprep.subr.bf16.mxu1 %v2053_v13 }
 0x844   :  { %1776 = vmatpush3.bf16.msra.mxu1 %v2343_v28 }
 0x845   :  { %1777 = vmatprep.subr.bf16.mxu1 %v2053_v13 }
 0x848   :  { %1778 = vmatpush3.bf16.msra.mxu1 %v2356_v31 }
 0x849   :  { %1779 = vmatprep.subr.bf16.mxu1 %v2053_v13 }
 0x84c   :  { %1780 = vmatpush3.bf16.msra.mxu1 %v2375_v36 }
 0x84d   :  { %1781 = vmatprep.subr.bf16.mxu1 %v2053_v13 }
 0x850   :  { %1782 = vmatpush3.bf16.msra.mxu1 %v2391_v40 }
 0x851   :  { %1783 = vmatprep.subr.bf16.mxu1 %v2053_v13 }
 0x854   :  { %1784 = vmatpush3.bf16.msra.mxu1 %v2401_v42 }
 0x855   :  { %1945 = vmatprep.subr.bf16.mxu1 %v2059_v45 }
 0x90a   :  { %v833_v17 = vpop.f32.mrb[24].mxu1 }
 0x90b   :  { %v839_v25 = vadd.f32 %v833_v17, %v434_v11  ;;  %v1747_v28 = vpop.f32.mrb[25].mxu1  ;;  %v1931_v11 = vpack.c.bf16 %v997_v53, %v996_v52  ;;  %v998_v17 = vld [vmem:[%s2746_s6 + $0x40] sm:$0xff] }
 0x90c   :  { %v836_v54 = vpop.f32.mrb[26].mxu1 }
 0x90d   :  { %v840_v31 = vmul.f32 0.5, %v839_v25  ;;  %2011 = vtanh.f32 %v839_v25  ;;  %v1748_v56 = vpop.f32.mrb[27].mxu1  ;;  %v999_v25 = vld [vmem:[%s2746_s6 + $0x48] sm:$0xff]  ;;  %v1000_v54 = vld [vmem:[%s2746_s6 + $0x50] sm:$0xff] }
 0x90e   :  { %v1934_v28 = vpack.c.bf16 %v999_v25, %v998_v17 }
 0x90f   :  { %2013 = vtanh.f32 %v840_v31  ;;  %v1001_v31 = vld [vmem:[%s2746_s6 + $0x58] sm:$0xff] }
 0x910   :  { %v1937_v56 = vpack.c.bf16 %v1001_v31, %v1000_v54 }
 0x917   :  { %v2012_v36 = vpop.eup %2011 }
 0x918   :  { %849 = vrot.lane.b32.xlu0 %v2012_v36, %s2058_s20 }
 0x919   :  { %v2014_v57 = vpop.eup %2013 }
 0x91a   :  { %v842_v40 = vadd.f32 1.0, %v2014_v57 }
 0x91c   :  { %v843_v55 = vmul.f32 0.5, %v842_v40 }
 0x91e   :  { %845 = vrot.lane.b32.xlu1 %v843_v55, %s2057_s5 }
 0x922   :  { %847 = vrot.lane.b32.xlu1 %v843_v55, %s2056_s19 }
 0x98a   :  { %v850_v42 = vpop.permute.xlu0 %849 }
 0x98b   :  { %v852_v59 = vmul.f32 %v850_v42, %v843_v55 }
 0x990   :  { %v846_v5 = vpop.permute.xlu1 %845 }
 0x991   :  { %v851_v60 = vmul.f32 %v846_v5, %v795_v49  ;;  %v994_v49 = vld [vmem:[%s2746_s6 + $0x20] sm:$0xff] }
 0x992   :  { %v1928_v51 = vpack.c.bf16 %v995_v50, %v994_v49  ;;  %v1002_v5 = vld [vmem:[%s2746_s6 + $0x60] sm:$0xff]  ;;  %v1257_v50 = vld [vmem:[%s2750_s10 + $0x10] sm:$0xff] }
 0x993   :  { %v853_v61 = vadd.f32 %v852_v59, %v851_v60  ;;  %v1003_v59 = vld [vmem:[%s2746_s6 + $0x68] sm:$0xff] }
 0x994   :  { %v848_v63 = vpop.permute.xlu1 %847  ;;  %v1940_v60 = vpack.c.bf16 %v1003_v59, %v1002_v5 }
 0x995   :  { %2015 = vtanh.f32 %v853_v61 }
 0x99f   :  { %v2016_v62 = vpop.eup %2015 }
 0x9a0   :  { %v855_v0 = vmul.f32 %v2016_v62, %v848_v63  ;;  %v1004_v62 = vld [vmem:[%s2746_s6 + $0x70] sm:$0xff]  ;;  %v1005_v63 = vld [vmem:[%s2746_s6 + $0x78] sm:$0xff]  ;;  %s1347_s6 = sshll.u32 %s2060_s0, 4  ;;  %s1348_s6 = int_to_ptr.vmem [resolvable:$true] %s1347_s6 }
 0x9a1   :  { %p2034_p1 = scmp.lt.s32.totalorder %s1348_s6, %s1348_s6 }
 0x9a2   :  { %v856_v1 = vpack.c.bf16 %v855_v0, %v855_v0  ;;  %v1943_v0 = vpack.c.bf16 %v1005_v63, %v1004_v62 }
 0x9a4   :  { %1766 = vmatmul.mubr.bf16.vlgmr.msra.gmra.mrb[28].mxu0 %v856_v1 }
 0x9a5   :  { %1821 = vmatprep.mubr.msk.f32.mxu0 %vm2054_vm0, %v2053_v13  ;;  %1923 = vmatpush3.bf16.msra.mxu0 %v1922_v3 }
 0x9a6   :  { %1924 = vmatprep.subr.bf16.mxu0 %v2059_v45 }
 0x9a9   :  { %1926 = vmatpush3.bf16.msra.mxu0 %v1925_v48 }
 0x9aa   :  { %1927 = vmatprep.subr.bf16.mxu0 %v2059_v45 }
 0x9ad   :  { %1929 = vmatpush3.bf16.msra.mxu0 %v1928_v51  ;;  %v1258_v51 = vld [vmem:[%s2750_s10 + $0x18] sm:$0xff] }
 0x9ae   :  { %1930 = vmatprep.subr.bf16.mxu0 %v2059_v45  ;;  %v1961_v52 = vpack.c.bf16 %v1258_v51, %v1257_v50 }
 0x9b1   :  { %1932 = vmatpush3.bf16.msra.mxu0 %v1931_v11 }
 0x9b2   :  { %1933 = vmatprep.subr.bf16.mxu0 %v2059_v45 }
 0x9b5   :  { %1935 = vmatpush3.bf16.msra.mxu0 %v1934_v28  ;;  %v1381_v28 = vld [vmem:[%s2751_s11] ss:$0 sm:$0xff] }
 0x9b6   :  { %1936 = vmatprep.subr.bf16.mxu0 %v2059_v45 }
 0x9b9   :  { %1938 = vmatpush3.bf16.msra.mxu0 %v1937_v56 }
 0x9ba   :  { %1939 = vmatprep.subr.bf16.mxu0 %v2059_v45 }
 0x9bd   :  { %1941 = vmatpush3.bf16.msra.mxu0 %v1940_v60 }
 0x9be   :  { %1942 = vmatprep.subr.bf16.mxu0 %v2059_v45 }
 0x9c1   :  { %1944 = vmatpush3.bf16.msra.mxu0 %v1943_v0 }
 0x9c2   :  { %1957 = vmatprep.subr.bf16.mxu0 %v2059_v45 }
 0xa77   :  { %v891_v7 = vpop.f32.mrb[28].mxu0 }
 0xa78   :  { %v897_v8 = vadd.f32 %v891_v7, %v439_v6  ;;  %v1767_v9 = vpop.f32.mrb[29].mxu0 }
 0xa79   :  { %v894_v10 = vpop.f32.mrb[30].mxu0  ;;  %v1083_v9 = vld [vmem:[%s2748_s8] sm:$0xff] }
 0xa7a   :  { %v898_v12 = vmul.f32 0.5, %v897_v8  ;;  %2017 = vtanh.f32 %v897_v8  ;;  %v1768_v14 = vpop.f32.mrb[31].mxu0  ;;  %v1084_v10 = vld [vmem:[%s2748_s8 + $0x8] sm:$0xff] }
 0xa7b   :  { %v1946_v14 = vpack.c.bf16 %v1084_v10, %v1083_v9 }
 0xa7c   :  { %2019 = vtanh.f32 %v898_v12  ;;  %v1085_v12 = vld [vmem:[%s2748_s8 + $0x10] sm:$0xff] }
 0xa84   :  { %v2018_v15 = vpop.eup %2017 }
 0xa85   :  { %907 = vrot.lane.b32.xlu1 %v2018_v15, %s2058_s20  ;;  %v1086_v15 = vld [vmem:[%s2748_s8 + $0x18] sm:$0xff] }
 0xa86   :  { %v2020_v16 = vpop.eup %2019 }
 0xa87   :  { %v900_v18 = vadd.f32 1.0, %v2020_v16 }
 0xa89   :  { %v901_v19 = vmul.f32 0.5, %v900_v18  ;;  %v1949_v18 = vpack.c.bf16 %v1086_v15, %v1085_v12 }
 0xa8b   :  { %903 = vrot.lane.b32.xlu0 %v901_v19, %s2057_s5 }
 0xa8f   :  { %905 = vrot.lane.b32.xlu0 %v901_v19, %s2056_s19 }
 0xaf7   :  { %v908_v20 = vpop.permute.xlu1 %907 }
 0xaf8   :  { %v910_v58 = vmul.f32 %v908_v20, %v901_v19 }
 0xafd   :  { %v904_v2 = vpop.permute.xlu0 %903 }
 0xafe   :  { %v909_v21 = vmul.f32 %v904_v2, %v853_v61  ;;  %v972_v61 = vlaneseq }
 0xb00   :  { %v911_v22 = vadd.f32 %v910_v58, %v909_v21  ;;  %v973_v1 = vand.u32 127, %v972_v61 }
 0xb01   :  { %v906_v24 = vpop.permute.xlu0 %905 }
 0xb02   :  { %2021 = vtanh.f32 %v911_v22  ;;  %vm974_vm2 = vcmp.lt.s32.totalorder %v973_v1, 32 }
 0xb0c   :  { %v2022_v23 = vpop.eup %2021 }
 0xb0d   :  { %v913_v26 = vmul.f32 %v2022_v23, %v906_v24 }
 0xb0f   :  { %v914_v27 = vpack.c.bf16 %v913_v26, %v913_v26 }
 0xb11   :  { %1786 = vmatmul.mubr.bf16.vlgmr.msra.gmra.mrb[28].mxu1 %v914_v27 }
 0xb12   :  { %1832 = vmatprep.mubr.msk.f32.mxu1 %vm2054_vm0, %v2053_v13  ;;  %1947 = vmatpush3.bf16.msra.mxu1 %v1946_v14 }
 0xb13   :  { %1948 = vmatprep.subr.bf16.mxu1 %v2059_v45 }
 0xb16   :  { %1950 = vmatpush3.bf16.msra.mxu1 %v1949_v18 }
 0xb17   :  { %1951 = vmatprep.subr.bf16.mxu1 %v2059_v45 }
 0xbe4   :  { %v949_v30 = vpop.f32.mrb[28].mxu1 }
 0xbe5   :  { %v955_v32 = vadd.f32 %v949_v30, %v442_v29  ;;  %v1787_v33 = vpop.f32.mrb[29].mxu1  ;;  %v1374_v30 = vld [vmem:[%s2748_s8 + $0x20] sm:$0xff] }
 0xbe6   :  { %v952_v34 = vpop.f32.mrb[30].mxu1  ;;  %v1371_v33 = vld [vmem:[%s2747_s7] ss:$0 sm:$0xff] }
 0xbe7   :  { %v956_v35 = vmul.f32 0.5, %v955_v32  ;;  %2023 = vtanh.f32 %v955_v32  ;;  %v1788_v37 = vpop.f32.mrb[31].mxu1  ;;  %v1375_v32 = vld [vmem:[%s2748_s8 + $0x28] sm:$0xff] }
 0xbe9   :  { %2025 = vtanh.f32 %v956_v35  ;;  %v1952_v35 = vpack.c.bf16 %v1375_v32, %v1374_v30 }
 0xbf1   :  { %v2024_v38 = vpop.eup %2023 }
 0xbf2   :  { %965 = vrot.lane.b32.xlu0 %v2024_v38, %s2058_s20 }
 0xbf3   :  { %v2026_v39 = vpop.eup %2025 }
 0xbf4   :  { %v958_v41 = vadd.f32 1.0, %v2026_v39  ;;  %v1376_v39 = vld [vmem:[%s2748_s8 + $0x30] sm:$0xff] }
 0xbf6   :  { %v959_v43 = vmul.f32 0.5, %v958_v41  ;;  %v1377_v41 = vld [vmem:[%s2748_s8 + $0x38] sm:$0xff] }
 0xbf8   :  { %961 = vrot.lane.b32.xlu1 %v959_v43, %s2057_s5 }
 0xbfc   :  { %963 = vrot.lane.b32.xlu1 %v959_v43, %s2056_s19 }
 0xc64   :  { %v966_v36 = vpop.permute.xlu0 %965 }
 0xc65   :  { %v968_v40 = vmul.f32 %v966_v36, %v959_v43  ;;  %v1955_v43 = vpack.c.bf16 %v1377_v41, %v1376_v39 }
 0xc6a   :  { %v962_v57 = vpop.permute.xlu1 %961 }
 0xc6b   :  { %v967_v55 = vmul.f32 %v962_v57, %v911_v22 }
 0xc6d   :  { %v969_v42 = vadd.f32 %v968_v40, %v967_v55 }
 0xc6e   :  { %v964_v7 = vpop.permute.xlu1 %963 }
 0xc6f   :  { %2027 = vtanh.f32 %v969_v42 }
 0xc79   :  { %v2028_v6 = vpop.eup %2027 }
 0xc7a   :  { %v971_v8 = vmul.f32 %v2028_v6, %v964_v7 }
 0xc7c   :  { %v976_v16 = vrot.slane %v971_v8, 4  ;;  %v975_v19 = vsel %vm974_vm2, %v971_v8, 0.0 }
 0xc7e   :  { %v977_v20 = vsel %vm974_vm2, %v976_v16, 0.0 }
 0xc7f   :  { %978 = vrot.lane.b32.xlu0 %v977_v20, %s2056_s19  ;;  %v981_v2 = vsub.f32 %v975_v19, %v977_v20  ;;  %v986_v58 = vmul.f32 %v977_v20, %v975_v19 }
 0xc81   :  { %v982_v21 = vand.u32 2147483647, %v981_v2 }
 0xc83   :  { %987 = vrot.lane.b32.xlu0 %v986_v58, %s2057_s5  ;;  %983 = vrot.lane.b32.xlu1 %v982_v21, %s2058_s20 }
 0xcf1   :  { %v979_v22 = vpop.permute.xlu0 %978 }
 0xcf2   :  { %v980_v23 = vadd.f32 %v979_v22, %v975_v19 }
 0xcf5   :  { %v984_v24 = vpop.permute.xlu1 %983  ;;  %v988_v27 = vpop.permute.xlu0 %987 }
 0xcf6   :  { %v985_v26 = vadd.f32 %v984_v24, %v980_v23 }
 0xcf8   :  { %v989_v29 = vadd.f32 %v988_v27, %v985_v26 }
 0xcfa   :  { %1822 = vmatmul.mubr.f32.vlgmr.msra.gmra.mrb[32].mxu0 %v989_v29 }
 0xcfb   :  { %1854 = vmatprep.mubr.msk.f32.mxu0 %vm2054_vm0, %v2053_v13 }
 0xdcd   :  { %v1079_v34 = vpop.f32.mrb[32].mxu0 }
 0xdce   :  { %v1080_v37 = vadd.f32 %v1371_v33, %v1079_v34  ;;  %v1823_v38 = vpop.f32.mrb[33].mxu0 }
 0xdd0   :  { %1833 = vmatmul.mubr.msk.f32.vlgmr.msra.gmra.mrb[32].mxu1 %vm367_vm1, %v1080_v37 }
 0xdd1   :  { %1953 = vmatpush3.bf16.msra.mxu1 %v1952_v35  ;;  %1843 = vmatprep.mubr.msk.f32.mxu1 %vm2054_vm0, %v2053_v13  ;;  %v1256_v13 = vld [vmem:[%s2750_s10 + $0x8] sm:$0xff]  ;;  %s2029_s10 = scalar_lea.vmem %s1348_s6, 64 }
 0xdd2   :  { %1954 = vmatprep.subr.bf16.mxu1 %v2059_v45  ;;  %v1958_v4 = vpack.c.bf16 %v1256_v13, %v1255_v46  ;;  %p2030_p0 = scmp.ne.s32.totalorder %s1348_s6, %s2029_s10  ;;  %p2035_p2 = scmp.lt.s32.totalorder %s2029_s10, %s2029_s10 }
 0xdd4   :  { %1959 = vmatpush3.bf16.msra.mxu0 %v1958_v4  ;;  %p2036_p3 = por %p2035_p2, %p2034_p1 }
 0xdd5   :  { %1956 = vmatpush3.bf16.msra.mxu1 %v1955_v43  ;;  %1960 = vmatprep.subr.bf16.mxu0 %v2059_v45  ;;  %v1379_v45 = vld [vmem:[%s2749_s9 + $0x1] ss:$0 sm:$0xff] }
 0xdd6   :  { %p2037_p4 = pnand %p2036_p3, %p2030_p0 }
 0xdd8   :  { %1962 = vmatpush3.bf16.msra.mxu0 %v1961_v52 }
 0xea3   :  { %v1163_v3 = vpop.f32.mrb[32].mxu1 }
 0xea4   :  { %v1164_v47 = vadd.f32 %v1372_v44, %v1163_v3  ;;  %v1834_v48 = vpop.f32.mrb[33].mxu1 }
 0xea6   :  { %v1167_v49 = vmax.f32 %v1164_v47, 0.0 }
 0xea8   :  { %1844 = vmatmul.mubr.msk.f32.vlgmr.msra.gmra.mrb[34].mxu1 %vm367_vm1, %v1167_v49 }
 0xf7b   :  { %v1250_v53 = vpop.f32.mrb[34].mxu1 }
 0xf7c   :  { %v1251_v11 = vadd.f32 %v1379_v45, %v1250_v53  ;;  %v1845_v17 = vpop.f32.mrb[35].mxu1 }
 0xf7e   :  { %v1254_v25 = vmax.f32 %v1251_v11, 0.0 }
 0xf80   :  { %1855 = vmatmul.mubr.msk.f32.vlgmr.msra.gmra.mrb[34].mxu0 %vm367_vm1, %v1254_v25 }
0x1053   :  { %v1335_v54 = vpop.f32.mrb[34].mxu0 }
0x1054   :  { %v1336_v31 = vadd.f32 %v1381_v28, %v1335_v54  ;;  %v1856_v56 = vpop.f32.mrb[35].mxu0 }
0x1056   :  { %1340 = vst.msk [vmem:[#allocation2] sm:$0xf] %vm1339_vm3, %v1336_v31 }
0x1057   :  { %2040 = shalt.err (!%p2037_p4)
}
0x1058   :  { %s2041_s19 = scalar_lea.hbm %s2752_s12, 64 }
0x1059   :  { %p2042_p5 = scmp.ne.s32.totalorder %s2752_s12, %s2041_s19  ;;  %p2045_p6 = scmp.lt.u32.totalorder %s2041_s19, %s2752_s12 }
0x105b   :  { %p2047_p7 = pnand %p2045_p6, %p2042_p5 }
0x105d   :  { %2050 = shalt.err (!%p2047_p7)
}
0x105e   :  { %1350 = dma.vmem_to_hbm [thread:$0]  %s1348_s6, 64, %s2752_s12, [#allocation3]  }
0x105f   :  { %2051 = dma.done.wait [#allocation3], 64  }
0x1060   :  { %2052 = vsyncadd [#allocation3], 4294967232 }
0x1061   :  { %1354 = vsyncpa [#allocation3], 1 }

</bundles_post_ra>
